<compile_context>
chip_gen: v6e
topology: v6e:2x2x1
jax: 0.10.0
libtpu: 0.0.40
codegen_flags: <defaults>
</compile_context>

<pallas_src>
import functools

import jax
import jax.numpy as jnp
from jax.experimental import pallas as pl
from jax.experimental.pallas import tpu as pltpu

LANE = 128  # padded N width (use 256 on v6e/v7x if batch/width grows)


# ----------------------------- Pallas kernels ------------------------------ #
def _conv_relu_pool_kernel(p_ref, w_ref, b_ref, o_ref, *, mq):
    """GEMM + bias + ReLU + 2x2 maxpool.

    p_ref: (4*mq, K_pad) bf16 im2col patches, grouped by pool-window parity
           (rows [q*mq:(q+1)*mq] hold window offset q = 2*rh + rw, same
            (b, hp, wp) ordering inside each group).
    w_ref: (K_pad, LANE) bf16, b_ref: (1, LANE) f32, o_ref: (mq, LANE) bf16.
    """
    acc = jnp.dot(p_ref[...], w_ref[...], preferred_element_type=jnp.float32)
    acc = jnp.maximum(acc + b_ref[...], 0.0)
    pooled = jnp.maximum(
        jnp.maximum(acc[0 * mq:1 * mq], acc[1 * mq:2 * mq]),
        jnp.maximum(acc[2 * mq:3 * mq], acc[3 * mq:4 * mq]),
    )
    o_ref[...] = pooled.astype(o_ref.dtype)


def _mlp_kernel(x_ref, w1_ref, b1_ref, w2_ref, b2_ref, w3_ref, b3_ref, o_ref):
    """fc1+ReLU -> fc2+ReLU -> fc3, all weights resident in VMEM."""
    h = jnp.dot(x_ref[...], w1_ref[...], preferred_element_type=jnp.float32)
    h = jnp.maximum(h + b1_ref[...], 0.0).astype(jnp.bfloat16)
    h = jnp.dot(h, w2_ref[...], preferred_element_type=jnp.float32)
    h = jnp.maximum(h + b2_ref[...], 0.0).astype(jnp.bfloat16)
    h = jnp.dot(h, w3_ref[...], preferred_element_type=jnp.float32)
    o_ref[...] = h + b3_ref[...]


# ------------------------------ conv wrapper -------------------------------- #
def conv_relu_pool(x_nhwc, w_pad, b_pad, *, cout, kh=5, kw=5):
    """x: (B, H, W, Cin) -> (B, (H-kh+1)//2, (W-kw+1)//2, cout), fused relu+pool."""
    B, H, W, C = x_nhwc.shape
    Ho, Wo = H - kh + 1, W - kw + 1
    Hp, Wp = Ho // 2, Wo // 2
    K = kh * kw * C
    K_pad, lane = w_pad.shape
    Mq = B * Hp * Wp
    Mq_pad = ((Mq + 7) // 8) * 8  # sublane-align each parity group

    # im2col (K order = (kh, kw, Cin)), then group rows by 2x2-pool parity.
    cols = [x_nhwc[:, i:i + Ho, j:j + Wo, :] for i in range(kh) for j in range(kw)]
    pat = jnp.stack(cols, axis=3).reshape(B, Ho, Wo, K)
    pat = pat.reshape(B, Hp, 2, Wp, 2, K).transpose(2, 4, 0, 1, 3, 5)
    pat = pat.reshape(4, Mq, K)
    pat = jnp.pad(pat, ((0, 0), (0, Mq_pad - Mq), (0, K_pad - K)))
    pat = pat.reshape(4 * Mq_pad, K_pad).astype(jnp.bfloat16)

    out = pl.pallas_call(
        functools.partial(_conv_relu_pool_kernel, mq=Mq_pad),
        out_shape=jax.ShapeDtypeStruct((Mq_pad, lane), jnp.bfloat16),
        grid=(1,),
        in_specs=[
            pl.BlockSpec((4 * Mq_pad, K_pad), lambda i: (0, 0)),
            pl.BlockSpec((K_pad, lane), lambda i: (0, 0)),
            pl.BlockSpec((1, lane), lambda i: (0, 0)),
        ],
        out_specs=pl.BlockSpec((Mq_pad, lane), lambda i: (0, 0)),
        compiler_params=pltpu.CompilerParams(dimension_semantics=("arbitrary",)),
    )(pat, w_pad, b_pad)
    return out[:Mq, :cout].reshape(B, Hp, Wp, cout)


def mlp_pallas(x, pp):
    """x: (B, 512) bf16 (padded flatten) -> (B, LANE) f32 logits (cols 10: zero)."""
    B = x.shape[0]
    return pl.pallas_call(
        _mlp_kernel,
        out_shape=jax.ShapeDtypeStruct((B, LANE), jnp.float32),
        grid=(1,),
        in_specs=[
            pl.BlockSpec((B, 512), lambda i: (0, 0)),
            pl.BlockSpec((512, LANE), lambda i: (0, 0)),
            pl.BlockSpec((1, LANE), lambda i: (0, 0)),
            pl.BlockSpec((LANE, LANE), lambda i: (0, 0)),
            pl.BlockSpec((1, LANE), lambda i: (0, 0)),
            pl.BlockSpec((LANE, LANE), lambda i: (0, 0)),
            pl.BlockSpec((1, LANE), lambda i: (0, 0)),
        ],
        out_specs=pl.BlockSpec((B, LANE), lambda i: (0, 0)),
        compiler_params=pltpu.CompilerParams(dimension_semantics=("arbitrary",)),
    )(x, pp["fc1_w"], pp["fc1_b"], pp["fc2_w"], pp["fc2_b"], pp["fc3_w"], pp["fc3_b"])


# ------------------------------- Net forward -------------------------------- #
def net_forward(x, pp):
    """x: (B, 3, 32, 32) f32 NCHW, pp: prepared (padded/bf16) params -> (B, 10)."""
    x = x.transpose(0, 2, 3, 1)                                   # NCHW -> NHWC
    x = conv_relu_pool(x, pp["conv1_w"], pp["conv1_b"], cout=6)   # (B, 14, 14, 6)
    x = conv_relu_pool(x, pp["conv2_w"], pp["conv2_b"], cout=16)  # (B, 5, 5, 16)
    B = x.shape[0]
    # torch x.view(-1, 16*5*5) flattens NCHW order -> transpose back before flatten.
    x = x.transpose(0, 3, 1, 2).reshape(B, 16 * 5 * 5)
    x = jnp.pad(x, ((0, 0), (0, 512 - 400))).astype(jnp.bfloat16)
    out = mlp_pallas(x, pp)
    return out[:, :10]


# ------------------------------ parameters ---------------------------------- #
def init_params(key):
    """PyTorch-shaped params, uniform(+-1/sqrt(fan_in)) like nn.Conv2d/Linear."""
    def uni(k, shape, fan_in):
        bound = 1.0 / jnp.sqrt(jnp.float32(fan_in))
        return jax.random.uniform(k, shape, jnp.float32, -bound, bound)

    ks = jax.random.split(key, 10)
    return {
        "conv1_w": uni(ks[0], (6, 3, 5, 5), 3 * 5 * 5),
        "conv1_b": uni(ks[1], (6,), 3 * 5 * 5),
        "conv2_w": uni(ks[2], (16, 6, 5, 5), 6 * 5 * 5),
        "conv2_b": uni(ks[3], (16,), 6 * 5 * 5),
        "fc1_w":   uni(ks[4], (16 * 5 * 5, 120), 16 * 5 * 5),  # stored (K, N)
        "fc1_b":   uni(ks[5], (120,), 16 * 5 * 5),
        "fc2_w":   uni(ks[6], (120, 84), 120),
        "fc2_b":   uni(ks[7], (84,), 120),
        "fc3_w":   uni(ks[8], (84, 10), 84),
        "fc3_b":   uni(ks[9], (10,), 84),
    }


def prepare_params(p):
    """One-time conversion to matmul-ready, lane-dense, bf16-padded weights."""
    def pad2(a, rows, cols):
        return jnp.pad(a, ((0, rows - a.shape[0]), (0, cols - a.shape[1])))

    def conv_w(w, k_pad):  # (Cout, Cin, kh, kw) -> (k_pad, LANE), K order (kh,kw,Cin)
        cout = w.shape[0]
        wm = w.transpose(2, 3, 1, 0).reshape(-1, cout)
        return pad2(wm, k_pad, LANE).astype(jnp.bfloat16)

    def fc_w(w, k_pad):
        return pad2(w, k_pad, LANE).astype(jnp.bfloat16)

    def bias(b):
        return jnp.pad(b, (0, LANE - b.shape[0])).reshape(1, LANE).astype(jnp.float32)

    return {
        "conv1_w": conv_w(p["conv1_w"], 128), "conv1_b": bias(p["conv1_b"]),
        "conv2_w": conv_w(p["conv2_w"], 256), "conv2_b": bias(p["conv2_b"]),
        "fc1_w": fc_w(p["fc1_w"], 512), "fc1_b": bias(p["fc1_b"]),
        "fc2_w": fc_w(p["fc2_w"], 128), "fc2_b": bias(p["fc2_b"]),
        "fc3_w": fc_w(p["fc3_w"], 128), "fc3_b": bias(p["fc3_b"]),
    }


# --------------------------- pure-JAX reference ------------------------------ #
def _reference_forward(x, p):
    def conv(x, w, b):
        y = jax.lax.conv_general_dilated(
            x, w, (1, 1), "VALID", dimension_numbers=("NCHW", "OIHW", "NCHW"))
        return jax.nn.relu(y + b[None, :, None, None])

    def pool(x):
        B, C, H, W = x.shape
        return x.reshape(B, C, H // 2, 2, W // 2, 2).max(axis=(3, 5))

    x = pool(conv(x, p["conv1_w"], p["conv1_b"]))
    x = pool(conv(x, p["conv2_w"], p["conv2_b"]))
    x = x.reshape(x.shape[0], -1)
    x = jax.nn.relu(x @ p["fc1_w"] + p["fc1_b"])
    x = jax.nn.relu(x @ p["fc2_w"] + p["fc2_b"])
    return x @ p["fc3_w"] + p["fc3_b"]


if __name__ == "__main__":
    key = jax.random.PRNGKey(0)
    k_x, k_p = jax.random.split(key)
    # Input spatial size is fixed to 32x32 by fc1 = Linear(16*5*5, 120).
    x = jax.random.normal(k_x, (2, 3, 32, 32), jnp.float32)
    params = init_params(k_p)
    prepped = prepare_params(params)          # one-time weight prep (not per forward)

    fwd = jax.jit(net_forward)
    out = jax.block_until_ready(fwd(x, prepped))
    assert out.shape == (2, 10), out.shape

    ref = _reference_forward(x, params)       # f32 reference; kernel uses bf16 MXU
    err = float(jnp.max(jnp.abs(out - ref)))
    assert err < 5e-2, f"max abs err vs reference: {err}"
    print("KERNEL_OK")
</pallas_src>

<mosaic_0001>
module attributes {stable_mosaic.version = 11 : i64} {
  func.func @_conv_relu_pool_kernel(%arg0: i32, %arg1: memref<1568x128xbf16, #tpu.memory_space<vmem>>, %arg2: memref<128x128xbf16, #tpu.memory_space<vmem>>, %arg3: memref<1x128xf32, #tpu.memory_space<vmem>>, %arg4: memref<392x128xbf16, #tpu.memory_space<vmem>>) attributes {dimension_semantics = [#tpu.dimension_semantics<arbitrary>], iteration_bounds = array<i64: 1>, scalar_prefetch = 0 : i64, scratch_operands = 0 : i64, tpu.core_type = #tpu.core_type<tc>, window_params = [{pipeline_mode = #tpu.pipeline_mode<synchronous>, transform_indices = @transform_0, window_bounds = array<i64: 1568, 128>}, {pipeline_mode = #tpu.pipeline_mode<synchronous>, transform_indices = @transform_1, window_bounds = array<i64: 128, 128>}, {pipeline_mode = #tpu.pipeline_mode<synchronous>, transform_indices = @transform_2, window_bounds = array<i64: 1, 128>}, {pipeline_mode = #tpu.pipeline_mode<synchronous>, transform_indices = @transform_3, window_bounds = array<i64: 392, 128>}]} {
    %c0 = arith.constant 0 : index
    %c0_0 = arith.constant 0 : index
    %0 = vector.load %arg1[%c0, %c0_0] : memref<1568x128xbf16, #tpu.memory_space<vmem>>, vector<1568x128xbf16>
    %c0_1 = arith.constant 0 : index
    %c0_2 = arith.constant 0 : index
    %1 = vector.load %arg2[%c0_1, %c0_2] : memref<128x128xbf16, #tpu.memory_space<vmem>>, vector<128x128xbf16>
    %cst = arith.constant dense<0.000000e+00> : vector<1568x128xf32>
    %2 = tpu.matmul %0, %1, %cst {dimension_numbers = #tpu.dot_dimension_numbers<[1], [0], [0], [1], [0, 0, 1, 1], [], []>} : vector<1568x128xbf16>, vector<128x128xbf16>, vector<1568x128xf32> -> vector<1568x128xf32>
    %c0_3 = arith.constant 0 : index
    %c0_4 = arith.constant 0 : index
    %3 = vector.load %arg3[%c0_3, %c0_4] : memref<1x128xf32, #tpu.memory_space<vmem>>, vector<1x128xf32>
    %4 = vector.broadcast %3 : vector<1x128xf32> to vector<1568x128xf32>
    %5 = arith.addf %2, %4 : vector<1568x128xf32>
    %cst_5 = arith.constant 0.000000e+00 : f32
    %6 = vector.broadcast %cst_5 : f32 to vector<1568x128xf32>
    %7 = arith.maximumf %5, %6 : vector<1568x128xf32>
    %8 = vector.extract_strided_slice %7 {offsets = [0, 0], sizes = [392, 128], strides = [1, 1]} : vector<1568x128xf32> to vector<392x128xf32>
    %9 = vector.extract_strided_slice %7 {offsets = [392, 0], sizes = [392, 128], strides = [1, 1]} : vector<1568x128xf32> to vector<392x128xf32>
    %10 = arith.maximumf %8, %9 : vector<392x128xf32>
    %11 = vector.extract_strided_slice %7 {offsets = [784, 0], sizes = [392, 128], strides = [1, 1]} : vector<1568x128xf32> to vector<392x128xf32>
    %12 = vector.extract_strided_slice %7 {offsets = [1176, 0], sizes = [392, 128], strides = [1, 1]} : vector<1568x128xf32> to vector<392x128xf32>
    %13 = arith.maximumf %11, %12 : vector<392x128xf32>
    %14 = arith.maximumf %10, %13 : vector<392x128xf32>
    %15 = arith.truncf %14 : vector<392x128xf32> to vector<392x128xbf16>
    %c0_6 = arith.constant 0 : index
    %c0_7 = arith.constant 0 : index
    %16 = vector.load %arg4[%c0_6, %c0_7] : memref<392x128xbf16, #tpu.memory_space<vmem>>, vector<392x128xbf16>
    tpu.vector_store %arg4[%c0_6, %c0_7], %15 {strides = array<i32>} : memref<392x128xbf16, #tpu.memory_space<vmem>>, vector<392x128xbf16>,
    return
  }
  func.func @transform_0(%arg0: i32) -> (i32, i32) {
    %c0_i32 = arith.constant 0 : i32
    %c0_i32_0 = arith.constant 0 : i32
    %c0_i32_1 = arith.constant 0 : i32
    return %c0_i32, %c0_i32_0 : i32, i32
  }
  func.func @transform_1(%arg0: i32) -> (i32, i32) {
    %c0_i32 = arith.constant 0 : i32
    %c0_i32_0 = arith.constant 0 : i32
    %c0_i32_1 = arith.constant 0 : i32
    return %c0_i32, %c0_i32_0 : i32, i32
  }
  func.func @transform_2(%arg0: i32) -> (i32, i32) {
    %c0_i32 = arith.constant 0 : i32
    %c0_i32_0 = arith.constant 0 : i32
    %c0_i32_1 = arith.constant 0 : i32
    return %c0_i32, %c0_i32_0 : i32, i32
  }
  func.func @transform_3(%arg0: i32) -> (i32, i32) {
    %c0_i32 = arith.constant 0 : i32
    %c0_i32_0 = arith.constant 0 : i32
    %c0_i32_1 = arith.constant 0 : i32
    return %c0_i32, %c0_i32_0 : i32, i32
  }
}

module attributes {stable_mosaic.version = 11 : i64} {
  func.func @_conv_relu_pool_kernel(%arg0: i32, %arg1: memref<224x256xbf16, #tpu.memory_space<vmem>>, %arg2: memref<256x128xbf16, #tpu.memory_space<vmem>>, %arg3: memref<1x128xf32, #tpu.memory_space<vmem>>, %arg4: memref<56x128xbf16, #tpu.memory_space<vmem>>) attributes {dimension_semantics = [#tpu.dimension_semantics<arbitrary>], iteration_bounds = array<i64: 1>, scalar_prefetch = 0 : i64, scratch_operands = 0 : i64, tpu.core_type = #tpu.core_type<tc>, window_params = [{pipeline_mode = #tpu.pipeline_mode<synchronous>, transform_indices = @transform_0, window_bounds = array<i64: 224, 256>}, {pipeline_mode = #tpu.pipeline_mode<synchronous>, transform_indices = @transform_1, window_bounds = array<i64: 256, 128>}, {pipeline_mode = #tpu.pipeline_mode<synchronous>, transform_indices = @transform_2, window_bounds = array<i64: 1, 128>}, {pipeline_mode = #tpu.pipeline_mode<synchronous>, transform_indices = @transform_3, window_bounds = array<i64: 56, 128>}]} {
    %c0 = arith.constant 0 : index
    %c0_0 = arith.constant 0 : index
    %0 = vector.load %arg1[%c0, %c0_0] : memref<224x256xbf16, #tpu.memory_space<vmem>>, vector<224x256xbf16>
    %c0_1 = arith.constant 0 : index
    %c0_2 = arith.constant 0 : index
    %1 = vector.load %arg2[%c0_1, %c0_2] : memref<256x128xbf16, #tpu.memory_space<vmem>>, vector<256x128xbf16>
    %cst = arith.constant dense<0.000000e+00> : vector<224x128xf32>
    %2 = tpu.matmul %0, %1, %cst {dimension_numbers = #tpu.dot_dimension_numbers<[1], [0], [0], [1], [0, 0, 1, 1], [], []>} : vector<224x256xbf16>, vector<256x128xbf16>, vector<224x128xf32> -> vector<224x128xf32>
    %c0_3 = arith.constant 0 : index
    %c0_4 = arith.constant 0 : index
    %3 = vector.load %arg3[%c0_3, %c0_4] : memref<1x128xf32, #tpu.memory_space<vmem>>, vector<1x128xf32>
    %4 = vector.broadcast %3 : vector<1x128xf32> to vector<224x128xf32>
    %5 = arith.addf %2, %4 : vector<224x128xf32>
    %cst_5 = arith.constant 0.000000e+00 : f32
    %6 = vector.broadcast %cst_5 : f32 to vector<224x128xf32>
    %7 = arith.maximumf %5, %6 : vector<224x128xf32>
    %8 = vector.extract_strided_slice %7 {offsets = [0, 0], sizes = [56, 128], strides = [1, 1]} : vector<224x128xf32> to vector<56x128xf32>
    %9 = vector.extract_strided_slice %7 {offsets = [56, 0], sizes = [56, 128], strides = [1, 1]} : vector<224x128xf32> to vector<56x128xf32>
    %10 = arith.maximumf %8, %9 : vector<56x128xf32>
    %11 = vector.extract_strided_slice %7 {offsets = [112, 0], sizes = [56, 128], strides = [1, 1]} : vector<224x128xf32> to vector<56x128xf32>
    %12 = vector.extract_strided_slice %7 {offsets = [168, 0], sizes = [56, 128], strides = [1, 1]} : vector<224x128xf32> to vector<56x128xf32>
    %13 = arith.maximumf %11, %12 : vector<56x128xf32>
    %14 = arith.maximumf %10, %13 : vector<56x128xf32>
    %15 = arith.truncf %14 : vector<56x128xf32> to vector<56x128xbf16>
    %c0_6 = arith.constant 0 : index
    %c0_7 = arith.constant 0 : index
    %16 = vector.load %arg4[%c0_6, %c0_7] : memref<56x128xbf16, #tpu.memory_space<vmem>>, vector<56x128xbf16>
    tpu.vector_store %arg4[%c0_6, %c0_7], %15 {strides = array<i32>} : memref<56x128xbf16, #tpu.memory_space<vmem>>, vector<56x128xbf16>,
    return
  }
  func.func @transform_0(%arg0: i32) -> (i32, i32) {
    %c0_i32 = arith.constant 0 : i32
    %c0_i32_0 = arith.constant 0 : i32
    %c0_i32_1 = arith.constant 0 : i32
    return %c0_i32, %c0_i32_0 : i32, i32
  }
  func.func @transform_1(%arg0: i32) -> (i32, i32) {
    %c0_i32 = arith.constant 0 : i32
    %c0_i32_0 = arith.constant 0 : i32
    %c0_i32_1 = arith.constant 0 : i32
    return %c0_i32, %c0_i32_0 : i32, i32
  }
  func.func @transform_2(%arg0: i32) -> (i32, i32) {
    %c0_i32 = arith.constant 0 : i32
    %c0_i32_0 = arith.constant 0 : i32
    %c0_i32_1 = arith.constant 0 : i32
    return %c0_i32, %c0_i32_0 : i32, i32
  }
  func.func @transform_3(%arg0: i32) -> (i32, i32) {
    %c0_i32 = arith.constant 0 : i32
    %c0_i32_0 = arith.constant 0 : i32
    %c0_i32_1 = arith.constant 0 : i32
    return %c0_i32, %c0_i32_0 : i32, i32
  }
}

module attributes {stable_mosaic.version = 11 : i64} {
  func.func @_mlp_kernel(%arg0: i32, %arg1: memref<2x512xbf16, #tpu.memory_space<vmem>>, %arg2: memref<512x128xbf16, #tpu.memory_space<vmem>>, %arg3: memref<1x128xf32, #tpu.memory_space<vmem>>, %arg4: memref<128x128xbf16, #tpu.memory_space<vmem>>, %arg5: memref<1x128xf32, #tpu.memory_space<vmem>>, %arg6: memref<128x128xbf16, #tpu.memory_space<vmem>>, %arg7: memref<1x128xf32, #tpu.memory_space<vmem>>, %arg8: memref<2x128xf32, #tpu.memory_space<vmem>>) attributes {dimension_semantics = [#tpu.dimension_semantics<arbitrary>], iteration_bounds = array<i64: 1>, scalar_prefetch = 0 : i64, scratch_operands = 0 : i64, tpu.core_type = #tpu.core_type<tc>, window_params = [{pipeline_mode = #tpu.pipeline_mode<synchronous>, transform_indices = @transform_0, window_bounds = array<i64: 2, 512>}, {pipeline_mode = #tpu.pipeline_mode<synchronous>, transform_indices = @transform_1, window_bounds = array<i64: 512, 128>}, {pipeline_mode = #tpu.pipeline_mode<synchronous>, transform_indices = @transform_2, window_bounds = array<i64: 1, 128>}, {pipeline_mode = #tpu.pipeline_mode<synchronous>, transform_indices = @transform_3, window_bounds = array<i64: 128, 128>}, {pipeline_mode = #tpu.pipeline_mode<synchronous>, transform_indices = @transform_4, window_bounds = array<i64: 1, 128>}, {pipeline_mode = #tpu.pipeline_mode<synchronous>, transform_indices = @transform_5, window_bounds = array<i64: 128, 128>}, {pipeline_mode = #tpu.pipeline_mode<synchronous>, transform_indices = @transform_6, window_bounds = array<i64: 1, 128>}, {pipeline_mode = #tpu.pipeline_mode<synchronous>, transform_indices = @transform_7, window_bounds = array<i64: 2, 128>}]} {
    %c0 = arith.constant 0 : index
    %c0_0 = arith.constant 0 : index
    %0 = vector.load %arg1[%c0, %c0_0] : memref<2x512xbf16, #tpu.memory_space<vmem>>, vector<2x512xbf16>
    %c0_1 = arith.constant 0 : index
    %c0_2 = arith.constant 0 : index
    %1 = vector.load %arg2[%c0_1, %c0_2] : memref<512x128xbf16, #tpu.memory_space<vmem>>, vector<512x128xbf16>
    %cst = arith.constant dense<0.000000e+00> : vector<2x128xf32>
    %2 = tpu.matmul %0, %1, %cst {dimension_numbers = #tpu.dot_dimension_numbers<[1], [0], [0], [1], [0, 0, 1, 1], [], []>} : vector<2x512xbf16>, vector<512x128xbf16>, vector<2x128xf32> -> vector<2x128xf32>
    %c0_3 = arith.constant 0 : index
    %c0_4 = arith.constant 0 : index
    %3 = vector.load %arg3[%c0_3, %c0_4] : memref<1x128xf32, #tpu.memory_space<vmem>>, vector<1x128xf32>
    %4 = vector.broadcast %3 : vector<1x128xf32> to vector<2x128xf32>
    %5 = arith.addf %2, %4 : vector<2x128xf32>
    %cst_5 = arith.constant 0.000000e+00 : f32
    %6 = vector.broadcast %cst_5 : f32 to vector<2x128xf32>
    %7 = arith.maximumf %5, %6 : vector<2x128xf32>
    %8 = arith.truncf %7 : vector<2x128xf32> to vector<2x128xbf16>
    %c0_6 = arith.constant 0 : index
    %c0_7 = arith.constant 0 : index
    %9 = vector.load %arg4[%c0_6, %c0_7] : memref<128x128xbf16, #tpu.memory_space<vmem>>, vector<128x128xbf16>
    %cst_8 = arith.constant dense<0.000000e+00> : vector<2x128xf32>
    %10 = tpu.matmul %8, %9, %cst_8 {dimension_numbers = #tpu.dot_dimension_numbers<[1], [0], [0], [1], [0, 0, 1, 1], [], []>} : vector<2x128xbf16>, vector<128x128xbf16>, vector<2x128xf32> -> vector<2x128xf32>
    %c0_9 = arith.constant 0 : index
    %c0_10 = arith.constant 0 : index
    %11 = vector.load %arg5[%c0_9, %c0_10] : memref<1x128xf32, #tpu.memory_space<vmem>>, vector<1x128xf32>
    %12 = vector.broadcast %11 : vector<1x128xf32> to vector<2x128xf32>
    %13 = arith.addf %10, %12 : vector<2x128xf32>
    %cst_11 = arith.constant 0.000000e+00 : f32
    %14 = vector.broadcast %cst_11 : f32 to vector<2x128xf32>
    %15 = arith.maximumf %13, %14 : vector<2x128xf32>
    %16 = arith.truncf %15 : vector<2x128xf32> to vector<2x128xbf16>
    %c0_12 = arith.constant 0 : index
    %c0_13 = arith.constant 0 : index
    %17 = vector.load %arg6[%c0_12, %c0_13] : memref<128x128xbf16, #tpu.memory_space<vmem>>, vector<128x128xbf16>
    %cst_14 = arith.constant dense<0.000000e+00> : vector<2x128xf32>
    %18 = tpu.matmul %16, %17, %cst_14 {dimension_numbers = #tpu.dot_dimension_numbers<[1], [0], [0], [1], [0, 0, 1, 1], [], []>} : vector<2x128xbf16>, vector<128x128xbf16>, vector<2x128xf32> -> vector<2x128xf32>
    %c0_15 = arith.constant 0 : index
    %c0_16 = arith.constant 0 : index
    %19 = vector.load %arg7[%c0_15, %c0_16] : memref<1x128xf32, #tpu.memory_space<vmem>>, vector<1x128xf32>
    %20 = vector.broadcast %19 : vector<1x128xf32> to vector<2x128xf32>
    %21 = arith.addf %18, %20 : vector<2x128xf32>
    %c0_17 = arith.constant 0 : index
    %c0_18 = arith.constant 0 : index
    %22 = vector.load %arg8[%c0_17, %c0_18] : memref<2x128xf32, #tpu.memory_space<vmem>>, vector<2x128xf32>
    tpu.vector_store %arg8[%c0_17, %c0_18], %21 {strides = array<i32>} : memref<2x128xf32, #tpu.memory_space<vmem>>, vector<2x128xf32>,
    return
  }
  func.func @transform_0(%arg0: i32) -> (i32, i32) {
    %c0_i32 = arith.constant 0 : i32
    %c0_i32_0 = arith.constant 0 : i32
    %c0_i32_1 = arith.constant 0 : i32
    return %c0_i32, %c0_i32_0 : i32, i32
  }
  func.func @transform_1(%arg0: i32) -> (i32, i32) {
    %c0_i32 = arith.constant 0 : i32
    %c0_i32_0 = arith.constant 0 : i32
    %c0_i32_1 = arith.constant 0 : i32
    return %c0_i32, %c0_i32_0 : i32, i32
  }
  func.func @transform_2(%arg0: i32) -> (i32, i32) {
    %c0_i32 = arith.constant 0 : i32
    %c0_i32_0 = arith.constant 0 : i32
    %c0_i32_1 = arith.constant 0 : i32
    return %c0_i32, %c0_i32_0 : i32, i32
  }
  func.func @transform_3(%arg0: i32) -> (i32, i32) {
    %c0_i32 = arith.constant 0 : i32
    %c0_i32_0 = arith.constant 0 : i32
    %c0_i32_1 = arith.constant 0 : i32
    return %c0_i32, %c0_i32_0 : i32, i32
  }
  func.func @transform_4(%arg0: i32) -> (i32, i32) {
    %c0_i32 = arith.constant 0 : i32
    %c0_i32_0 = arith.constant 0 : i32
    %c0_i32_1 = arith.constant 0 : i32
    return %c0_i32, %c0_i32_0 : i32, i32
  }
  func.func @transform_5(%arg0: i32) -> (i32, i32) {
    %c0_i32 = arith.constant 0 : i32
    %c0_i32_0 = arith.constant 0 : i32
    %c0_i32_1 = arith.constant 0 : i32
    return %c0_i32, %c0_i32_0 : i32, i32
  }
  func.func @transform_6(%arg0: i32) -> (i32, i32) {
    %c0_i32 = arith.constant 0 : i32
    %c0_i32_0 = arith.constant 0 : i32
    %c0_i32_1 = arith.constant 0 : i32
    return %c0_i32, %c0_i32_0 : i32, i32
  }
  func.func @transform_7(%arg0: i32) -> (i32, i32) {
    %c0_i32 = arith.constant 0 : i32
    %c0_i32_0 = arith.constant 0 : i32
    %c0_i32_1 = arith.constant 0 : i32
    return %c0_i32, %c0_i32_0 : i32, i32
  }
}

</mosaic_0001>

<bundles_post_ra>
// kernel: net_forward.3
= control target key start
LH: loop header
LB: loop body
LE: loop exit
PB: predicated region body
PF: predicated region fallthrough
CT: control target
= control target key end

     0   :  { %s4456_s1 = inlined_call_operand.vmem [shape: bf16[128,128], index: 1, kind: input, shape index: {}]   ;;  %s4457_s0 = inlined_call_operand.vmem [shape: bf16[1568,128], index: 0, kind: input, shape index: {}]   ;;  %s4458_s2 = inlined_call_operand.vmem [shape: f32[1,128], index: 2, kind: input, shape index: {}]   ;;  %s4459_s3 = inlined_call_operand.vmem [shape: bf16[392,128], index: 3, kind: output, shape index: {}]  }
   0x1   :  { %v2962_v0 = vld [vmem:[%s4456_s1 + $0x38] sm:$0xff]   ;;  %v2963_v1 = vld [vmem:[%s4456_s1 + $0x30] sm:$0xff]   ;;  %v2964_v2 = vld [vmem:[%s4456_s1 + $0x28] sm:$0xff]  }
   0x2   :  { %2734 = vmatprep.subr.bf16.mxu0 %v2962_v0  ;;  %2946 = vmatprep.subr.bf16.mxu1 %v2962_v0  ;;  %v2965_v3 = vld [vmem:[%s4456_s1 + $0x20] sm:$0xff]   ;;  %v2971_v5 = vld [vmem:[%s4457_s0 + $0x190] sm:$0xff]   ;;  %v2966_v6 = vld [vmem:[%s4456_s1 + $0x18] sm:$0xff]  }
   0x3   :  { %2735 = vmatpush3.bf16.msra.mxu0 %v2962_v0  ;;  %2954 = vmatpush3.bf16.msra.mxu1 %v2962_v0  ;;  %v2970_v4 = vld [vmem:[%s4457_s0] sm:$0xff]   ;;  %v2967_v7 = vld [vmem:[%s4456_s1 + $0x10] sm:$0xff]   ;;  %v2968_v8 = vld [vmem:[%s4456_s1 + $0x8] sm:$0xff]  }
   0x4   :  { %2736 = vmatprep.subr.bf16.mxu0 %v2963_v1  ;;  %2947 = vmatprep.subr.bf16.mxu1 %v2963_v1  ;;  %v2969_v9 = vld [vmem:[%s4456_s1] sm:$0xff]   ;;  %v2972_v10 = vld [vmem:[%s4457_s0 + $0x8] sm:$0xff]   ;;  %v2973_v11 = vld [vmem:[%s4457_s0 + $0x198] sm:$0xff]  }
   0x5   :  { %2750 = vmatprep.mubr.bf16.mxu0 %v2970_v4  ;;  %2850 = vmatprep.mubr.bf16.mxu1 %v2971_v5  ;;  %v2974_v12 = vld [vmem:[%s4457_s0 + $0x10] sm:$0xff]   ;;  %v2975_v13 = vld [vmem:[%s4457_s0 + $0x1a0] sm:$0xff]   ;;  %v2976_v14 = vld [vmem:[%s4457_s0 + $0x18] sm:$0xff]  }
   0x6   :  { %v2977_v15 = vld [vmem:[%s4457_s0 + $0x1a8] sm:$0xff]   ;;  %v2978_v16 = vld [vmem:[%s4457_s0 + $0x20] sm:$0xff]   ;;  %v2979_v17 = vld [vmem:[%s4457_s0 + $0x1b0] sm:$0xff]  }
   0x7   :  { %2737 = vmatpush3.bf16.msra.mxu0 %v2963_v1  ;;  %2955 = vmatpush3.bf16.msra.mxu1 %v2963_v1  ;;  %v2980_v18 = vld [vmem:[%s4457_s0 + $0x28] sm:$0xff]   ;;  %v2981_v19 = vld [vmem:[%s4457_s0 + $0x1b8] sm:$0xff]   ;;  %v2982_v20 = vld [vmem:[%s4457_s0 + $0x30] sm:$0xff]  }
   0x8   :  { %2738 = vmatprep.subr.bf16.mxu0 %v2964_v2  ;;  %2948 = vmatprep.subr.bf16.mxu1 %v2964_v2  ;;  %v2983_v21 = vld [vmem:[%s4457_s0 + $0x1c0] sm:$0xff]   ;;  %v2984_v22 = vld [vmem:[%s4457_s0 + $0x38] sm:$0xff]   ;;  %v2985_v23 = vld [vmem:[%s4457_s0 + $0x1c8] sm:$0xff]  }
   0x9   :  { %v2986_v24 = vld [vmem:[%s4457_s0 + $0x40] sm:$0xff]   ;;  %v2987_v25 = vld [vmem:[%s4457_s0 + $0x1d0] sm:$0xff]   ;;  %v2988_v26 = vld [vmem:[%s4457_s0 + $0x48] sm:$0xff]  }
   0xa   :  { %v2989_v27 = vld [vmem:[%s4457_s0 + $0x1d8] sm:$0xff]   ;;  %v2990_v28 = vld [vmem:[%s4457_s0 + $0x50] sm:$0xff]   ;;  %v2991_v29 = vld [vmem:[%s4457_s0 + $0x1e0] sm:$0xff]  }
   0xb   :  { %2739 = vmatpush3.bf16.msra.mxu0 %v2964_v2  ;;  %2956 = vmatpush3.bf16.msra.mxu1 %v2964_v2  ;;  %v2992_v30 = vld [vmem:[%s4457_s0 + $0x58] sm:$0xff]   ;;  %v2993_v31 = vld [vmem:[%s4457_s0 + $0x1e8] sm:$0xff]   ;;  %v2994_v32 = vld [vmem:[%s4457_s0 + $0x60] sm:$0xff]  }
   0xc   :  { %2740 = vmatprep.subr.bf16.mxu0 %v2965_v3  ;;  %2949 = vmatprep.subr.bf16.mxu1 %v2965_v3  ;;  %v2995_v33 = vld [vmem:[%s4457_s0 + $0x1f0] sm:$0xff]   ;;  %v2996_v34 = vld [vmem:[%s4457_s0 + $0x68] sm:$0xff]   ;;  %v2997_v35 = vld [vmem:[%s4457_s0 + $0x1f8] sm:$0xff]  }
   0xd   :  { %v2998_v36 = vld [vmem:[%s4457_s0 + $0x70] sm:$0xff]   ;;  %v2999_v37 = vld [vmem:[%s4457_s0 + $0x200] sm:$0xff]   ;;  %v3000_v38 = vld [vmem:[%s4457_s0 + $0x78] sm:$0xff]  }
   0xe   :  { %v3001_v39 = vld [vmem:[%s4457_s0 + $0x208] sm:$0xff]   ;;  %v3002_v40 = vld [vmem:[%s4457_s0 + $0x80] sm:$0xff]   ;;  %v3003_v41 = vld [vmem:[%s4457_s0 + $0x210] sm:$0xff]  }
   0xf   :  { %2741 = vmatpush3.bf16.msra.mxu0 %v2965_v3  ;;  %2957 = vmatpush3.bf16.msra.mxu1 %v2965_v3  ;;  %v3004_v42 = vld [vmem:[%s4457_s0 + $0x88] sm:$0xff]   ;;  %v3005_v43 = vld [vmem:[%s4457_s0 + $0x218] sm:$0xff]   ;;  %v3006_v44 = vld [vmem:[%s4457_s0 + $0x90] sm:$0xff]  }
  0x10   :  { %2742 = vmatprep.subr.bf16.mxu0 %v2966_v6  ;;  %2950 = vmatprep.subr.bf16.mxu1 %v2966_v6  ;;  %v3007_v45 = vld [vmem:[%s4457_s0 + $0x220] sm:$0xff]   ;;  %v3008_v46 = vld [vmem:[%s4457_s0 + $0x98] sm:$0xff]   ;;  %v3009_v47 = vld [vmem:[%s4457_s0 + $0x228] sm:$0xff]  }
  0x11   :  { %v3010_v48 = vld [vmem:[%s4457_s0 + $0xa0] sm:$0xff]   ;;  %v3011_v49 = vld [vmem:[%s4457_s0 + $0x230] sm:$0xff]   ;;  %v3012_v50 = vld [vmem:[%s4457_s0 + $0xa8] sm:$0xff]  }
  0x12   :  { %v3013_v51 = vld [vmem:[%s4457_s0 + $0x238] sm:$0xff]   ;;  %v3014_v52 = vld [vmem:[%s4457_s0 + $0xb0] sm:$0xff]   ;;  %v3015_v53 = vld [vmem:[%s4457_s0 + $0x240] sm:$0xff]  }
  0x13   :  { %2743 = vmatpush3.bf16.msra.mxu0 %v2966_v6  ;;  %2958 = vmatpush3.bf16.msra.mxu1 %v2966_v6  ;;  %v3016_v54 = vld [vmem:[%s4457_s0 + $0xb8] sm:$0xff]   ;;  %v3017_v55 = vld [vmem:[%s4457_s0 + $0x248] sm:$0xff]   ;;  %v3018_v56 = vld [vmem:[%s4457_s0 + $0xc0] sm:$0xff]  }
  0x14   :  { %2744 = vmatprep.subr.bf16.mxu0 %v2967_v7  ;;  %2951 = vmatprep.subr.bf16.mxu1 %v2967_v7  ;;  %v3019_v57 = vld [vmem:[%s4457_s0 + $0x250] sm:$0xff]   ;;  %v3020_v58 = vld [vmem:[%s4457_s0 + $0xc8] sm:$0xff]   ;;  %v3021_v59 = vld [vmem:[%s4457_s0 + $0x258] sm:$0xff]  }
  0x15   :  { %v3022_v60 = vld [vmem:[%s4457_s0 + $0xd0] sm:$0xff]   ;;  %v3023_v61 = vld [vmem:[%s4457_s0 + $0x260] sm:$0xff]   ;;  %v3024_v62 = vld [vmem:[%s4457_s0 + $0xd8] sm:$0xff]  }
  0x16   :  { %v3025_v63 = vld [vmem:[%s4457_s0 + $0x268] sm:$0xff]   ;;  %v3026_v0 = vld [vmem:[%s4457_s0 + $0xe0] sm:$0xff]   ;;  %v3027_v1 = vld [vmem:[%s4457_s0 + $0x270] sm:$0xff]  }
  0x17   :  { %2745 = vmatpush3.bf16.msra.mxu0 %v2967_v7  ;;  %2959 = vmatpush3.bf16.msra.mxu1 %v2967_v7  ;;  %v3028_v2 = vld [vmem:[%s4457_s0 + $0xe8] sm:$0xff]   ;;  %v3029_v3 = vld [vmem:[%s4457_s0 + $0x278] sm:$0xff]   ;;  %v3030_v4 = vld [vmem:[%s4457_s0 + $0xf0] sm:$0xff]  }
  0x18   :  { %2746 = vmatprep.subr.bf16.mxu0 %v2968_v8  ;;  %2952 = vmatprep.subr.bf16.mxu1 %v2968_v8  ;;  %v3031_v5 = vld [vmem:[%s4457_s0 + $0x280] sm:$0xff]   ;;  %v3032_v6 = vld [vmem:[%s4457_s0 + $0xf8] sm:$0xff]   ;;  %v3033_v7 = vld [vmem:[%s4457_s0 + $0x288] sm:$0xff]  }
  0x1b   :  { %2747 = vmatpush3.bf16.msra.mxu0 %v2968_v8  ;;  %2960 = vmatpush3.bf16.msra.mxu1 %v2968_v8  ;;  %v3034_v8 = vld [vmem:[%s4457_s0 + $0x100] sm:$0xff]  }
  0x1c   :  { %2748 = vmatprep.subr.bf16.mxu0 %v2969_v9  ;;  %2953 = vmatprep.subr.bf16.mxu1 %v2969_v9 }
  0x1f   :  { %2749 = vmatpush3.bf16.msra.mxu0 %v2969_v9  ;;  %2961 = vmatpush3.bf16.msra.mxu1 %v2969_v9  ;;  %v3035_v9 = vld [vmem:[%s4457_s0 + $0x290] sm:$0xff]  }
  0x22   :  { %2751 = vmatmul.mubr.bf16.vlgmr.msra.gmra.mxu0 %v2972_v10  ;;  %2851 = vmatmul.mubr.bf16.vlgmr.msra.gmra.mxu1 %v2973_v11  ;;  %v3036_v10 = vld [vmem:[%s4457_s0 + $0x108] sm:$0xff]   ;;  %v3037_v11 = vld [vmem:[%s4457_s0 + $0x298] sm:$0xff]  }
  0x23   :  { %2754 = vmatprep.mubr.bf16.mxu0 %v2974_v12  ;;  %2854 = vmatprep.mubr.bf16.mxu1 %v2975_v13  ;;  %v3038_v12 = vld [vmem:[%s4457_s0 + $0x110] sm:$0xff]   ;;  %v3039_v13 = vld [vmem:[%s4457_s0 + $0x2a0] sm:$0xff]  }
  0x2a   :  { %2755 = vmatmul.mubr.bf16.gmra.mxu0 %v2976_v14  ;;  %2855 = vmatmul.mubr.bf16.gmra.mxu1 %v2977_v15  ;;  %v3040_v14 = vld [vmem:[%s4457_s0 + $0x118] sm:$0xff]   ;;  %v3041_v15 = vld [vmem:[%s4457_s0 + $0x2a8] sm:$0xff]  }
  0x2b   :  { %2758 = vmatprep.mubr.bf16.mxu0 %v2978_v16  ;;  %2858 = vmatprep.mubr.bf16.mxu1 %v2979_v17  ;;  %v3042_v16 = vld [vmem:[%s4457_s0 + $0x120] sm:$0xff]   ;;  %v3043_v17 = vld [vmem:[%s4457_s0 + $0x2b0] sm:$0xff]  }
  0x32   :  { %2759 = vmatmul.mubr.bf16.gmra.mxu0 %v2980_v18  ;;  %2859 = vmatmul.mubr.bf16.gmra.mxu1 %v2981_v19  ;;  %v3044_v18 = vld [vmem:[%s4457_s0 + $0x128] sm:$0xff]   ;;  %v3045_v19 = vld [vmem:[%s4457_s0 + $0x2b8] sm:$0xff]  }
  0x33   :  { %2762 = vmatprep.mubr.bf16.mxu0 %v2982_v20  ;;  %2862 = vmatprep.mubr.bf16.mxu1 %v2983_v21  ;;  %v3046_v20 = vld [vmem:[%s4457_s0 + $0x130] sm:$0xff]   ;;  %v3047_v21 = vld [vmem:[%s4457_s0 + $0x2c0] sm:$0xff]  }
  0x3a   :  { %2763 = vmatmul.mubr.bf16.gmra.mxu0 %v2984_v22  ;;  %2863 = vmatmul.mubr.bf16.gmra.mxu1 %v2985_v23  ;;  %v3048_v22 = vld [vmem:[%s4457_s0 + $0x138] sm:$0xff]   ;;  %v3049_v23 = vld [vmem:[%s4457_s0 + $0x2c8] sm:$0xff]  }
  0x3b   :  { %2766 = vmatprep.mubr.bf16.mxu0 %v2986_v24  ;;  %2866 = vmatprep.mubr.bf16.mxu1 %v2987_v25  ;;  %v3050_v24 = vld [vmem:[%s4457_s0 + $0x140] sm:$0xff]   ;;  %v3051_v25 = vld [vmem:[%s4457_s0 + $0x2d0] sm:$0xff]  }
  0x42   :  { %2767 = vmatmul.mubr.bf16.gmra.mxu0 %v2988_v26  ;;  %2867 = vmatmul.mubr.bf16.gmra.mxu1 %v2989_v27  ;;  %v3052_v26 = vld [vmem:[%s4457_s0 + $0x148] sm:$0xff]   ;;  %v3053_v27 = vld [vmem:[%s4457_s0 + $0x2d8] sm:$0xff]  }
  0x43   :  { %2770 = vmatprep.mubr.bf16.mxu0 %v2990_v28  ;;  %2870 = vmatprep.mubr.bf16.mxu1 %v2991_v29  ;;  %v3054_v28 = vld [vmem:[%s4457_s0 + $0x150] sm:$0xff]   ;;  %v3055_v29 = vld [vmem:[%s4457_s0 + $0x2e0] sm:$0xff]  }
  0x4a   :  { %2771 = vmatmul.mubr.bf16.gmra.mxu0 %v2992_v30  ;;  %2871 = vmatmul.mubr.bf16.gmra.mxu1 %v2993_v31  ;;  %v3056_v30 = vld [vmem:[%s4457_s0 + $0x158] sm:$0xff]   ;;  %v3057_v31 = vld [vmem:[%s4457_s0 + $0x2e8] sm:$0xff]  }
  0x4b   :  { %2774 = vmatprep.mubr.bf16.mxu0 %v2994_v32  ;;  %2874 = vmatprep.mubr.bf16.mxu1 %v2995_v33  ;;  %v3058_v32 = vld [vmem:[%s4457_s0 + $0x160] sm:$0xff]   ;;  %v3059_v33 = vld [vmem:[%s4457_s0 + $0x2f0] sm:$0xff]  }
  0x52   :  { %2775 = vmatmul.mubr.bf16.gmra.mxu0 %v2996_v34  ;;  %2875 = vmatmul.mubr.bf16.gmra.mxu1 %v2997_v35  ;;  %v3060_v34 = vld [vmem:[%s4457_s0 + $0x168] sm:$0xff]   ;;  %v3061_v35 = vld [vmem:[%s4457_s0 + $0x2f8] sm:$0xff]  }
  0x53   :  { %2778 = vmatprep.mubr.bf16.mxu0 %v2998_v36  ;;  %2878 = vmatprep.mubr.bf16.mxu1 %v2999_v37  ;;  %v3062_v36 = vld [vmem:[%s4457_s0 + $0x170] sm:$0xff]   ;;  %v3063_v37 = vld [vmem:[%s4457_s0 + $0x300] sm:$0xff]  }
  0x5a   :  { %2779 = vmatmul.mubr.bf16.gmra.mxu0 %v3000_v38  ;;  %2879 = vmatmul.mubr.bf16.gmra.mxu1 %v3001_v39  ;;  %v3064_v38 = vld [vmem:[%s4457_s0 + $0x178] sm:$0xff]   ;;  %v3065_v39 = vld [vmem:[%s4457_s0 + $0x308] sm:$0xff]  }
  0x5b   :  { %2782 = vmatprep.mubr.bf16.mxu0 %v3002_v40  ;;  %2882 = vmatprep.mubr.bf16.mxu1 %v3003_v41  ;;  %v3066_v40 = vld [vmem:[%s4457_s0 + $0x180] sm:$0xff]   ;;  %v3067_v41 = vld [vmem:[%s4457_s0 + $0x188] sm:$0xff]  }
  0x62   :  { %2783 = vmatmul.mubr.bf16.gmra.mxu0 %v3004_v42  ;;  %2883 = vmatmul.mubr.bf16.gmra.mxu1 %v3005_v43 }
  0x63   :  { %2786 = vmatprep.mubr.bf16.mxu0 %v3006_v44  ;;  %2886 = vmatprep.mubr.bf16.mxu1 %v3007_v45 }
  0x6a   :  { %2787 = vmatmul.mubr.bf16.gmra.mxu0 %v3008_v46  ;;  %2887 = vmatmul.mubr.bf16.gmra.mxu1 %v3009_v47 }
  0x6b   :  { %2790 = vmatprep.mubr.bf16.mxu0 %v3010_v48  ;;  %2890 = vmatprep.mubr.bf16.mxu1 %v3011_v49 }
  0x72   :  { %2791 = vmatmul.mubr.bf16.gmra.mxu0 %v3012_v50  ;;  %2891 = vmatmul.mubr.bf16.gmra.mxu1 %v3013_v51 }
  0x73   :  { %2794 = vmatprep.mubr.bf16.mxu0 %v3014_v52  ;;  %2894 = vmatprep.mubr.bf16.mxu1 %v3015_v53 }
  0x7a   :  { %2795 = vmatmul.mubr.bf16.gmra.mxu0 %v3016_v54  ;;  %2895 = vmatmul.mubr.bf16.gmra.mxu1 %v3017_v55 }
  0x7b   :  { %2798 = vmatprep.mubr.bf16.mxu0 %v3018_v56  ;;  %2898 = vmatprep.mubr.bf16.mxu1 %v3019_v57 }
  0x82   :  { %2799 = vmatmul.mubr.bf16.gmra.mxu0 %v3020_v58  ;;  %2899 = vmatmul.mubr.bf16.gmra.mxu1 %v3021_v59 }
  0x83   :  { %2802 = vmatprep.mubr.bf16.mxu0 %v3022_v60  ;;  %2902 = vmatprep.mubr.bf16.mxu1 %v3023_v61 }
  0x8a   :  { %2803 = vmatmul.mubr.bf16.gmra.mxu0 %v3024_v62  ;;  %2903 = vmatmul.mubr.bf16.gmra.mxu1 %v3025_v63 }
  0x8b   :  { %2806 = vmatprep.mubr.bf16.mxu0 %v3026_v0  ;;  %2906 = vmatprep.mubr.bf16.mxu1 %v3027_v1 }
  0x92   :  { %2807 = vmatmul.mubr.bf16.gmra.mxu0 %v3028_v2  ;;  %2907 = vmatmul.mubr.bf16.gmra.mxu1 %v3029_v3 }
  0x93   :  { %2810 = vmatprep.mubr.bf16.mxu0 %v3030_v4  ;;  %2910 = vmatprep.mubr.bf16.mxu1 %v3031_v5 }
  0x9a   :  { %2811 = vmatmul.mubr.bf16.gmra.mxu0 %v3032_v6  ;;  %2911 = vmatmul.mubr.bf16.gmra.mxu1 %v3033_v7 }
  0x9b   :  { %2814 = vmatprep.mubr.bf16.mxu0 %v3034_v8  ;;  %2914 = vmatprep.mubr.bf16.mxu1 %v3035_v9 }
  0xa2   :  { %2815 = vmatmul.mubr.bf16.gmra.mxu0 %v3036_v10  ;;  %2915 = vmatmul.mubr.bf16.gmra.mxu1 %v3037_v11 }
  0xa3   :  { %2818 = vmatprep.mubr.bf16.mxu0 %v3038_v12  ;;  %2918 = vmatprep.mubr.bf16.mxu1 %v3039_v13 }
  0xaa   :  { %2819 = vmatmul.mubr.bf16.gmra.mxu0 %v3040_v14  ;;  %2919 = vmatmul.mubr.bf16.gmra.mxu1 %v3041_v15 }
  0xab   :  { %2822 = vmatprep.mubr.bf16.mxu0 %v3042_v16  ;;  %2922 = vmatprep.mubr.bf16.mxu1 %v3043_v17 }
  0xb2   :  { %2823 = vmatmul.mubr.bf16.gmra.mxu0 %v3044_v18  ;;  %2923 = vmatmul.mubr.bf16.gmra.mxu1 %v3045_v19 }
  0xb3   :  { %2826 = vmatprep.mubr.bf16.mxu0 %v3046_v20  ;;  %2926 = vmatprep.mubr.bf16.mxu1 %v3047_v21 }
  0xba   :  { %2827 = vmatmul.mubr.bf16.gmra.mxu0 %v3048_v22  ;;  %2927 = vmatmul.mubr.bf16.gmra.mxu1 %v3049_v23 }
  0xbb   :  { %2830 = vmatprep.mubr.bf16.mxu0 %v3050_v24  ;;  %2930 = vmatprep.mubr.bf16.mxu1 %v3051_v25 }
  0xc2   :  { %2831 = vmatmul.mubr.bf16.gmra.mxu0 %v3052_v26  ;;  %2931 = vmatmul.mubr.bf16.gmra.mxu1 %v3053_v27 }
  0xc3   :  { %2834 = vmatprep.mubr.bf16.mxu0 %v3054_v28  ;;  %2934 = vmatprep.mubr.bf16.mxu1 %v3055_v29 }
  0xca   :  { %2835 = vmatmul.mubr.bf16.gmra.mxu0 %v3056_v30  ;;  %2935 = vmatmul.mubr.bf16.gmra.mxu1 %v3057_v31 }
  0xcb   :  { %2838 = vmatprep.mubr.bf16.mxu0 %v3058_v32  ;;  %2938 = vmatprep.mubr.bf16.mxu1 %v3059_v33 }
  0xd2   :  { %2839 = vmatmul.mubr.bf16.gmra.mxu0 %v3060_v34  ;;  %2939 = vmatmul.mubr.bf16.gmra.mxu1 %v3061_v35 }
  0xd3   :  { %2842 = vmatprep.mubr.bf16.mxu0 %v3062_v36  ;;  %2942 = vmatprep.mubr.bf16.mxu1 %v3063_v37  ;;  %v3524_v36 = vld [vmem:[%s4458_s2] ss:$0 sm:$0xff] }
  0xda   :  { %2843 = vmatmul.mubr.bf16.gmra.mxu0 %v3064_v38  ;;  %2943 = vmatmul.mubr.bf16.gmra.mxu1 %v3065_v39 }
  0xdb   :  { %2846 = vmatprep.mubr.bf16.mxu0 %v3066_v40 }
  0xe2   :  { %v3407_v42 = vpop.f32.mrf.mxu0  ;;  %2847 = vmatmul.mubr.bf16.gmra.mxu0 %v3067_v41  ;;  %v2852_v43 = vpop.f32.mrf.mxu1 }
  0xe3   :  { %v3532_v39 = vadd.f32 %v3407_v42, %v3524_v36  ;;  %v3535_v40 = vadd.f32 %v2852_v43, %v3524_v36 }
  0xe4   :  { %v3409_v44 = vpop.f32.mrf.mxu0  ;;  %v3411_v45 = vpop.f32.mrf.mxu1 }
  0xe5   :  { %4519 = vst [vmem:[#allocation7_spill] sm:$0xff] %v3532_v39  ;;  %4520 = vst [vmem:[#allocation8_spill] sm:$0xff] %v3535_v40 }
  0xe6   :  { %v3413_v46 = vpop.f32.mrf.mxu0  ;;  %v3415_v47 = vpop.f32.mrf.mxu1 }
  0xe7   :  { %v3555_v42 = vadd.f32 %v3415_v47, %v3524_v36 }
  0xe8   :  { %v3417_v48 = vpop.f32.mrf.mxu0  ;;  %v3419_v49 = vpop.f32.mrf.mxu1 }
  0xe9   :  { %4523 = vst [vmem:[#allocation11_spill] sm:$0xff] %v3555_v42 }
  0xea   :  { %v3421_v50 = vpop.f32.mrf.mxu0  ;;  %v3423_v51 = vpop.f32.mrf.mxu1 }
  0xeb   :  { %v3573_v47 = vadd.f32 %v3421_v50, %v3524_v36 }
  0xec   :  { %v3425_v52 = vpop.f32.mrf.mxu0  ;;  %v3427_v53 = vpop.f32.mrf.mxu1 }
  0xed   :  { %4525 = vst [vmem:[#allocation13_spill] sm:$0xff] %v3573_v47 }
  0xee   :  { %v3429_v54 = vpop.f32.mrf.mxu0  ;;  %v3431_v55 = vpop.f32.mrf.mxu1 }
  0xef   :  { %v3593_v50 = vadd.f32 %v3429_v54, %v3524_v36 }
  0xf0   :  { %v3433_v56 = vpop.f32.mrf.mxu0  ;;  %v3435_v57 = vpop.f32.mrf.mxu1 }
  0xf1   :  { %4530 = vst [vmem:[#allocation18_spill] sm:$0xff] %v3593_v50  ;;  %v3610_v54 = vadd.f32 %v3524_v36, %v3433_v56  ;;  %v3614_v40 = vadd.f32 %v3524_v36, %v3435_v57 }
  0xf2   :  { %v3437_v58 = vpop.f32.mrf.mxu0  ;;  %v3439_v59 = vpop.f32.mrf.mxu1 }
  0xf4   :  { %v3441_v60 = vpop.f32.mrf.mxu0  ;;  %v3443_v61 = vpop.f32.mrf.mxu1 }
  0xf6   :  { %v3445_v62 = vpop.f32.mrf.mxu0  ;;  %v3447_v63 = vpop.f32.mrf.mxu1 }
  0xf7   :  { %v3644_v47 = vadd.f32 %v3445_v62, %v3524_v36  ;;  %v3648_v42 = vadd.f32 %v3447_v63, %v3524_v36 }
  0xf8   :  { %v3449_v0 = vpop.f32.mrf.mxu0  ;;  %v3451_v1 = vpop.f32.mrf.mxu1 }
  0xf9   :  { %4534 = vst [vmem:[#allocation22_spill] sm:$0xff] %v3648_v42  ;;  %v3665_v63 = vadd.f32 %v3524_v36, %v3451_v1 }
  0xfa   :  { %v3453_v2 = vpop.f32.mrf.mxu0  ;;  %v3455_v3 = vpop.f32.mrf.mxu1 }
  0xfc   :  { %v3457_v4 = vpop.f32.mrf.mxu0  ;;  %v3459_v5 = vpop.f32.mrf.mxu1 }
  0xfd   :  { %v3681_v62 = vadd.f32 %v3524_v36, %v3457_v4  ;;  %v3685_v1 = vadd.f32 %v3524_v36, %v3459_v5 }
  0xfe   :  { %v3461_v6 = vpop.f32.mrf.mxu0  ;;  %v3463_v7 = vpop.f32.mrf.mxu1 }
  0xff   :  { %4537 = vst [vmem:[#allocation25_spill] sm:$0xff] %v3685_v1  ;;  %v3702_v5 = vadd.f32 %v3463_v7, %v3524_v36 }
 0x100   :  { %v3465_v8 = vpop.f32.mrf.mxu0  ;;  %v3467_v9 = vpop.f32.mrf.mxu1 }
 0x101   :  { %4539 = vst [vmem:[#allocation27_spill] sm:$0xff] %v3702_v5 }
 0x102   :  { %v3469_v10 = vpop.f32.mrf.mxu0  ;;  %v3471_v11 = vpop.f32.mrf.mxu1 }
 0x103   :  { %v3716_v50 = vadd.f32 %v3469_v10, %v3524_v36  ;;  %v3720_v7 = vadd.f32 %v3471_v11, %v3524_v36 }
 0x104   :  { %v3473_v12 = vpop.f32.mrf.mxu0  ;;  %v3475_v13 = vpop.f32.mrf.mxu1 }
 0x105   :  { %4540 = vst [vmem:[#allocation28_spill] sm:$0xff] %v3716_v50  ;;  %4541 = vst [vmem:[#allocation29_spill] sm:$0xff] %v3720_v7  ;;  %v3732_v10 = vadd.f32 %v3524_v36, %v3473_v12  ;;  %v3736_v11 = vadd.f32 %v3524_v36, %v3475_v13 }
 0x106   :  { %v3477_v14 = vpop.f32.mrf.mxu0  ;;  %v3479_v15 = vpop.f32.mrf.mxu1 }
 0x107   :  { %4542 = vst [vmem:[#allocation30_spill] sm:$0xff] %v3732_v10  ;;  %4543 = vst [vmem:[#allocation31_spill] sm:$0xff] %v3736_v11  ;;  %v3744_v42 = vadd.f32 %v3479_v15, %v3524_v36 }
 0x108   :  { %v3481_v16 = vpop.f32.mrf.mxu0  ;;  %v3483_v17 = vpop.f32.mrf.mxu1 }
 0x109   :  { %4545 = vst [vmem:[#allocation33_spill] sm:$0xff] %v3744_v42  ;;  %v3755_v13 = vadd.f32 %v3524_v36, %v3481_v16  ;;  %v3761_v15 = vadd.f32 %v3524_v36, %v3483_v17 }
 0x10a   :  { %v3485_v18 = vpop.f32.mrf.mxu0  ;;  %v3487_v19 = vpop.f32.mrf.mxu1 }
 0x10b   :  { %4546 = vst [vmem:[#allocation34_spill] sm:$0xff] %v3761_v15  ;;  %v3765_v1 = vadd.f32 %v3485_v18, %v3524_v36  ;;  %v3773_v16 = vadd.f32 %v3487_v19, %v3524_v36 }
 0x10c   :  { %v3489_v20 = vpop.f32.mrf.mxu0  ;;  %v3491_v21 = vpop.f32.mrf.mxu1 }
 0x10d   :  { %4547 = vst [vmem:[#allocation35_spill] sm:$0xff] %v3765_v1  ;;  %4548 = vst [vmem:[#allocation36_spill] sm:$0xff] %v3773_v16  ;;  %v3781_v17 = vadd.f32 %v3524_v36, %v3491_v21 }
 0x10e   :  { %v3493_v22 = vpop.f32.mrf.mxu0  ;;  %v3495_v23 = vpop.f32.mrf.mxu1 }
 0x10f   :  { %4550 = vst [vmem:[#allocation38_spill] sm:$0xff] %v3781_v17  ;;  %v3785_v18 = vadd.f32 %v3493_v22, %v3524_v36  ;;  %v3798_v21 = vadd.f32 %v3495_v23, %v3524_v36 }
 0x110   :  { %v3497_v24 = vpop.f32.mrf.mxu0  ;;  %v3499_v25 = vpop.f32.mrf.mxu1 }
 0x111   :  { %4551 = vst [vmem:[#allocation39_spill] sm:$0xff] %v3785_v18  ;;  %4552 = vst [vmem:[#allocation40_spill] sm:$0xff] %v3798_v21  ;;  %v3802_v22 = vadd.f32 %v3524_v36, %v3497_v24 }
 0x112   :  { %v3501_v26 = vpop.f32.mrf.mxu0  ;;  %v3503_v27 = vpop.f32.mrf.mxu1 }
 0x113   :  { %4553 = vst [vmem:[#allocation41_spill] sm:$0xff] %v3802_v22  ;;  %v3816_v23 = vadd.f32 %v3503_v27, %v3524_v36 }
 0x114   :  { %v3505_v28 = vpop.f32.mrf.mxu0  ;;  %v3507_v29 = vpop.f32.mrf.mxu1 }
 0x115   :  { %4556 = vst [vmem:[#allocation44_spill] sm:$0xff] %v3816_v23  ;;  %v3832_v27 = vadd.f32 %v3524_v36, %v3507_v29 }
 0x116   :  { %v3509_v30 = vpop.f32.mrf.mxu0  ;;  %v3511_v31 = vpop.f32.mrf.mxu1 }
 0x117   :  { %4557 = vst [vmem:[#allocation45_spill] sm:$0xff] %v3832_v27  ;;  %v3836_v1 = vadd.f32 %v3509_v30, %v3524_v36  ;;  %v3840_v42 = vadd.f32 %v3511_v31, %v3524_v36 }
 0x118   :  { %v3513_v32 = vpop.f32.mrf.mxu0  ;;  %v3515_v33 = vpop.f32.mrf.mxu1 }
 0x119   :  { %4514 = vst [vmem:[#allocation2_spill] sm:$0xff] %v3515_v33  ;;  %4558 = vst [vmem:[#allocation46_spill] sm:$0xff] %v3836_v1  ;;  %v3851_v29 = vadd.f32 %v3524_v36, %v3513_v32 }
 0x11a   :  { %v3517_v34 = vpop.f32.mrf.mxu0  ;;  %v3519_v35 = vpop.f32.mrf.mxu1  ;;  %4559 = vst [vmem:[#allocation47_spill] sm:$0xff] %v3840_v42 }
 0x11b   :  { %4515 = vst [vmem:[#allocation3_spill] sm:$0xff] %v3517_v34  ;;  %4516 = vst [vmem:[#allocation4_spill] sm:$0xff] %v3519_v35  ;;  %v3543_v35 = vadd.f32 %v3524_v36, %v3409_v44  ;;  %v3563_v44 = vadd.f32 %v3524_v36, %v3417_v48  ;;  %v3581_v48 = vadd.f32 %v3423_v51, %v3524_v36 }
 0x11c   :  { %v3526_v37 = vpop.f32.mrf.mxu0  ;;  %v3528_v38 = vpop.f32.mrf.mxu1 }
 0x11d   :  { %4517 = vst [vmem:[#allocation5_spill] sm:$0xff] %v3526_v37  ;;  %4518 = vst [vmem:[#allocation6_spill] sm:$0xff] %v3528_v38  ;;  %v3547_v37 = vadd.f32 %v3524_v36, %v3411_v45  ;;  %v3551_v38 = vadd.f32 %v3413_v46, %v3524_v36  ;;  %v3569_v46 = vadd.f32 %v3524_v36, %v3419_v49 }
 0x11e   :  { %v3537_v41 = vpop.f32.mrf.mxu0  ;;  %v3539_v34 = vpop.f32.mrf.mxu1  ;;  %4528 = vst [vmem:[#allocation16_spill] sm:$0xff] %v3581_v48  ;;  %v3589_v49 = vadd.f32 %v3524_v36, %v3427_v53  ;;  %v3606_v53 = vadd.f32 %v3431_v55, %v3524_v36  ;;  %v3620_v45 = vadd.f32 %v3437_v58, %v3524_v36  ;;  %v3624_v55 = vadd.f32 %v3439_v59, %v3524_v36 }
 0x11f   :  { %4521 = vst [vmem:[#allocation9_spill] sm:$0xff] %v3537_v41  ;;  %4522 = vst [vmem:[#allocation10_spill] sm:$0xff] %v3539_v34  ;;  %v3585_v34 = vadd.f32 %v3524_v36, %v3425_v52  ;;  %v3636_v58 = vadd.f32 %v3524_v36, %v3441_v60  ;;  %v3640_v59 = vadd.f32 %v3524_v36, %v3443_v61 }
 0x120   :  { %v3557_v43 = vpop.f32.mrf.mxu0  ;;  %v3559_v41 = vpop.f32.mrf.mxu1  ;;  %4529 = vst [vmem:[#allocation17_spill] sm:$0xff] %v3589_v49  ;;  %4531 = vst [vmem:[#allocation19_spill] sm:$0xff] %v3606_v53  ;;  %v3659_v61 = vadd.f32 %v3524_v36, %v3449_v0  ;;  %v3669_v49 = vadd.f32 %v3453_v2, %v3524_v36  ;;  %v3677_v0 = vadd.f32 %v3455_v3, %v3524_v36  ;;  %v4560_v31 = vld [vmem:[#allocation2_spill] sm:$0xff] }
 0x121   :  { %4524 = vst [vmem:[#allocation12_spill] sm:$0xff] %v3557_v43  ;;  %4532 = vst [vmem:[#allocation20_spill] sm:$0xff] %v3620_v45  ;;  %v3689_v2 = vadd.f32 %v3461_v6, %v3524_v36  ;;  %v3706_v6 = vadd.f32 %v3524_v36, %v3465_v8  ;;  %v3710_v48 = vadd.f32 %v3524_v36, %v3467_v9 }
 0x122   :  { %v3575_v33 = vpop.f32.mrf.mxu0  ;;  %v3577_v43 = vpop.f32.mrf.mxu1  ;;  %4533 = vst [vmem:[#allocation21_spill] sm:$0xff] %v3624_v55  ;;  %4535 = vst [vmem:[#allocation23_spill] sm:$0xff] %v3669_v49  ;;  %v3740_v49 = vadd.f32 %v3477_v14, %v3524_v36  ;;  %v3777_v14 = vadd.f32 %v3524_v36, %v3489_v20  ;;  %v3857_v17 = vadd.f32 %v3524_v36, %v4560_v31  ;;  %v4563_v16 = vld [vmem:[#allocation4_spill] sm:$0xff] }
 0x123   :  { %4526 = vst [vmem:[#allocation14_spill] sm:$0xff] %v3575_v33  ;;  %4527 = vst [vmem:[#allocation15_spill] sm:$0xff] %v3577_v43  ;;  %v3869_v32 = vadd.f32 %v4563_v16, %v3524_v36 }
 0x124   :  { %v3599_v43 = vpop.f32.mrf.mxu0  ;;  %v3601_v52 = vpop.f32.mrf.mxu1  ;;  %4536 = vst [vmem:[#allocation24_spill] sm:$0xff] %v3677_v0  ;;  %4538 = vst [vmem:[#allocation26_spill] sm:$0xff] %v3689_v2  ;;  %v3806_v0 = vadd.f32 %v3524_v36, %v3499_v25  ;;  %v3812_v2 = vadd.f32 %v3501_v26, %v3524_v36  ;;  %v3828_v26 = vadd.f32 %v3524_v36, %v3505_v28  ;;  %v4565_v21 = vld [vmem:[#allocation5_spill] sm:$0xff]  ;;  %v4566_v18 = vld [vmem:[#allocation6_spill] sm:$0xff] }
 0x125   :  { %4544 = vst [vmem:[#allocation32_spill] sm:$0xff] %v3740_v49  ;;  %4549 = vst [vmem:[#allocation37_spill] sm:$0xff] %v3777_v14  ;;  %v4561_v14 = vld [vmem:[#allocation3_spill] sm:$0xff]  ;;  %v3873_v30 = vadd.f32 %v3524_v36, %v4565_v21  ;;  %v3877_v31 = vadd.f32 %v3524_v36, %v4566_v18 }
 0x126   :  { %v3626_v33 = vpop.f32.mrf.mxu0  ;;  %v3628_v56 = vpop.f32.mrf.mxu1  ;;  %4554 = vst [vmem:[#allocation42_spill] sm:$0xff] %v3806_v0  ;;  %4555 = vst [vmem:[#allocation43_spill] sm:$0xff] %v3812_v2  ;;  %v3861_v49 = vadd.f32 %v4561_v14, %v3524_v36  ;;  %v4567_v23 = vld [vmem:[#allocation9_spill] sm:$0xff]  ;;  %v4569_v18 = vld [vmem:[#allocation10_spill] sm:$0xff]  ;;  %v3902_v0 = vadd.f32 %v3524_v36, %v3559_v41 }
 0x127   :  { %4564 = vst [vmem:[#allocation3_spill] sm:$0xff] %v3869_v32  ;;  %v3881_v14 = vadd.f32 %v4567_v23, %v3524_v36  ;;  %v3894_v10 = vadd.f32 %v4569_v18, %v3524_v36  ;;  %v3936_v27 = vadd.f32 %v3628_v56, %v3524_v36 }
 0x128   :  { %v3650_v57 = vpop.f32.mrf.mxu0  ;;  %v3652_v51 = vpop.f32.mrf.mxu1  ;;  %v4570_v23 = vld [vmem:[#allocation12_spill] sm:$0xff] }
 0x129   :  { %4568 = vst [vmem:[#allocation4_spill] sm:$0xff] %v3881_v14  ;;  %4577 = vst [vmem:[#allocation12_spill] sm:$0xff] %v3936_v27  ;;  %v3953_v56 = vadd.f32 %v3524_v36, %v3652_v51 }
 0x12a   :  { %v3671_v39 = vpop.f32.mrf.mxu0  ;;  %v3673_v60 = vpop.f32.mrf.mxu1  ;;  %v4571_v2 = vld [vmem:[#allocation14_spill] sm:$0xff]  ;;  %v4573_v11 = vld [vmem:[#allocation15_spill] sm:$0xff] }
 0x12b   :  { %v3908_v42 = vadd.f32 %v4571_v2, %v3524_v36  ;;  %v3912_v18 = vadd.f32 %v4573_v11, %v3524_v36  ;;  %v3924_v2 = vadd.f32 %v3524_v36, %v3599_v43  ;;  %v3928_v11 = vadd.f32 %v3524_v36, %v3601_v52 }
 0x12c   :  { %v3695_v45 = vpop.f32.mrf.mxu0  ;;  %v3697_v4 = vpop.f32.mrf.mxu1  ;;  %v3947_v52 = vadd.f32 %v3524_v36, %v3650_v57  ;;  %v3961_v32 = vadd.f32 %v3673_v60, %v3524_v36 }
 0x12d   :  { %4572 = vst [vmem:[#allocation5_spill] sm:$0xff] %v3908_v42  ;;  %4574 = vst [vmem:[#allocation6_spill] sm:$0xff] %v3912_v18  ;;  %v3965_v57 = vadd.f32 %v3524_v36, %v3695_v45  ;;  %v3969_v14 = vadd.f32 %v3524_v36, %v3697_v4 }
 0x12e   :  { %v3722_v53 = vpop.f32.mrf.mxu0  ;;  %v3724_v8 = vpop.f32.mrf.mxu1  ;;  %4581 = vst [vmem:[#allocation49_spill] sm:$0xff] %v3961_v32 }
 0x12f   :  { %4582 = vst [vmem:[#allocation50_spill] sm:$0xff] %v3965_v57  ;;  %4583 = vst [vmem:[#allocation51_spill] sm:$0xff] %v3969_v14  ;;  %v3983_v4 = vadd.f32 %v3722_v53, %v3524_v36 }
 0x130   :  { %v3746_v9 = vpop.f32.mrf.mxu0  ;;  %v3748_v3 = vpop.f32.mrf.mxu1 }
 0x131   :  { %4586 = vst [vmem:[#allocation54_spill] sm:$0xff] %v3983_v4  ;;  %v3993_v18 = vadd.f32 %v3524_v36, %v3746_v9  ;;  %v3997_v45 = vadd.f32 %v3524_v36, %v3748_v3 }
 0x132   :  { %v3767_v55 = vpop.f32.mrf.mxu0  ;;  %v3769_v12 = vpop.f32.mrf.mxu1 }
 0x133   :  { %4588 = vst [vmem:[#allocation56_spill] sm:$0xff] %v3997_v45  ;;  %v4008_v9 = vadd.f32 %v3767_v55, %v3524_v36  ;;  %v4012_v3 = vadd.f32 %v3769_v12, %v3524_v36 }
 0x134   :  { %v3791_v50 = vpop.f32.mrf.mxu0  ;;  %v3793_v20 = vpop.f32.mrf.mxu1 }
 0x135   :  { %4591 = vst [vmem:[#allocation58_spill] sm:$0xff] %v4008_v9  ;;  %4592 = vst [vmem:[#allocation59_spill] sm:$0xff] %v4012_v3 }
 0x136   :  { %v3818_v5 = vpop.f32.mrf.mxu0  ;;  %v3820_v24 = vpop.f32.mrf.mxu1 }
 0x138   :  { %v3842_v25 = vpop.f32.mrf.mxu0  ;;  %v3844_v19 = vpop.f32.mrf.mxu1 }
 0x13a   :  { %v3863_v7 = vpop.f32.mrf.mxu0  ;;  %v3865_v28 = vpop.f32.mrf.mxu1 }
 0x13b   :  { %4562 = vst [vmem:[#allocation2_spill] sm:$0xff] %v3865_v28  ;;  %v3898_v28 = vadd.f32 %v3524_v36, %v4570_v23 }
 0x13c   :  { %v3887_v15 = vpop.f32.mrf.mxu0  ;;  %v3889_v21 = vpop.f32.mrf.mxu1 }
 0x13e   :  { %v3914_v1 = vpop.f32.mrf.mxu0  ;;  %v3916_v23 = vpop.f32.mrf.mxu1 }
 0x13f   :  { %4575 = vst [vmem:[#allocation9_spill] sm:$0xff] %v3914_v1  ;;  %v3932_v1 = vadd.f32 %v3626_v33, %v3524_v36 }
 0x140   :  { %v3938_v41 = vpop.f32.mrf.mxu0  ;;  %v3940_v16 = vpop.f32.mrf.mxu1 }
 0x141   :  { %4576 = vst [vmem:[#allocation10_spill] sm:$0xff] %v3932_v1  ;;  %4578 = vst [vmem:[#allocation14_spill] sm:$0xff] %v3938_v41  ;;  %v4016_v41 = vadd.f32 %v3524_v36, %v3791_v50 }
 0x142   :  { %4579 = vst [vmem:[#allocation15_spill] sm:$0xff] %v3940_v16  ;;  %v3957_v16 = vadd.f32 %v3671_v39, %v3524_v36  ;;  %v2800_v22 = vpop.f32.mrf.mxu0  ;;  %v2900_v43 = vpop.f32.mrf.mxu1  ;;  %v4589_v39 = vmax.f32 %v3563_v44, 0.0 }
 0x143   :  { %v1105_v51 = vadd.f32 %v2800_v22, %v3524_v36  ;;  %v3987_v22 = vadd.f32 %v3724_v8, %v3524_v36  ;;  %4593 = vst [vmem:[#allocation60_spill] sm:$0xff] %v4016_v41  ;;  %v1505_v32 = vadd.f32 %v2900_v43, %v3524_v36 }
 0x144   :  { %4580 = vst [vmem:[#allocation48_spill] sm:$0xff] %v3957_v16  ;;  %v3976_v60 = vpop.f32.mrf.mxu0  ;;  %v3978_v42 = vpop.f32.mrf.mxu1 }
 0x145   :  { %4584 = vst [vmem:[#allocation52_spill] sm:$0xff] %v3976_v60  ;;  %4585 = vst [vmem:[#allocation53_spill] sm:$0xff] %v3978_v42  ;;  %v1737_v33 = vmax.f32 %v1105_v51, 0.0  ;;  %v1837_v3 = vmax.f32 %v1505_v32, 0.0 }
 0x146   :  { %4587 = vst [vmem:[#allocation55_spill] sm:$0xff] %v3987_v22  ;;  %v2801_v42 = vpop.f32.mrf.mxu0  ;;  %v2901_v53 = vpop.f32.mrf.mxu1  ;;  %v4037_v22 = vadd.f32 %v3818_v5, %v3524_v36 }
 0x147   :  { %v4004_v27 = vmax.f32 %v4589_v39, %v1737_v33  ;;  %v1108_v60 = vadd.f32 %v2801_v42, %v3524_v36  ;;  %v4028_v42 = vadd.f32 %v3524_v36, %v3793_v20  ;;  %v1508_v12 = vadd.f32 %v2901_v53, %v3524_v36  ;;  %v4596_v20 = vld [vmem:[#allocation7_spill] sm:$0xff] }
 0x148   :  { %v1099_v8 = vpop.f32.mrf.mxu0  ;;  %v1499_v51 = vpop.f32.mrf.mxu1  ;;  %4595 = vst [vmem:[#allocation62_spill] sm:$0xff] %v4037_v22  ;;  %v4597_v45 = vmax.f32 %v4596_v20, 0.0 }
 0x149   :  { %4590 = vst [vmem:[#allocation57_spill] sm:$0xff] %v4004_v27  ;;  %v1100_v39 = vadd.f32 %v3524_v36, %v1099_v8  ;;  %v1500_v55 = vadd.f32 %v3524_v36, %v1499_v51  ;;  %v1738_v50 = vmax.f32 %v1108_v60, 0.0  ;;  %4594 = vst [vmem:[#allocation61_spill] sm:$0xff] %v4028_v42  ;;  %v4600_v8 = vmax.f32 %v3547_v37, 0.0 }
 0x14a   :  { %v2804_v14 = vpop.f32.mrf.mxu0  ;;  %v2904_v57 = vpop.f32.mrf.mxu1  ;;  %v1838_v37 = vmax.f32 %v1508_v12, 0.0 }
 0x14b   :  { %v1736_v44 = vmax.f32 %v1100_v39, 0.0  ;;  %v1836_v4 = vmax.f32 %v1500_v55, 0.0  ;;  %v1121_v33 = vadd.f32 %v2804_v14, %v3524_v36  ;;  %v1885_v39 = vmax.f32 %v4597_v45, %v1738_v50 }
 0x14c   :  { %v1112_v43 = vpop.f32.mrf.mxu0  ;;  %v1512_v60 = vpop.f32.mrf.mxu1  ;;  %v4598_v55 = vmax.f32 %v3543_v35, 0.0  ;;  %v1521_v45 = vadd.f32 %v2904_v57, %v3524_v36  ;;  %v4601_v57 = vmax.f32 %v3569_v46, 0.0 }
 0x14d   :  { %v1934_v51 = vmax.f32 %v4600_v8, %v1836_v4  ;;  %v1741_v27 = vmax.f32 %v1121_v33, 0.0  ;;  %v1113_v53 = vadd.f32 %v3524_v36, %v1112_v43  ;;  %v1513_v41 = vadd.f32 %v3524_v36, %v1512_v60 }
 0x14e   :  { %v4043_v14 = vmax.f32 %v4598_v55, %v1736_v44  ;;  %v2805_v9 = vpop.f32.mrf.mxu0  ;;  %v2905_v16 = vpop.f32.mrf.mxu1  ;;  %v4054_v44 = vadd.f32 %v3820_v24, %v3524_v36  ;;  %v1935_v20 = vmax.f32 %v4601_v57, %v1837_v3  ;;  %v4603_v24 = vmax.f32 %v3551_v38, 0.0  ;;  %v4604_v55 = vld [vmem:[#allocation11_spill] sm:$0xff] }
 0x14f   :  { %v1983_v1 = vmax.f32 %v1885_v39, %v1934_v51  ;;  %v1124_v35 = vadd.f32 %v2805_v9, %v3524_v36  ;;  %v1739_v32 = vmax.f32 %v1113_v53, 0.0  ;;  %v1839_v4 = vmax.f32 %v1513_v41, 0.0 }
 0x150   :  { %4599 = vst [vmem:[#allocation7_spill] sm:$0xff] %v4043_v14  ;;  %v1115_v33 = vpop.f32.mrf.mxu0  ;;  %v1515_v50 = vpop.f32.mrf.mxu1  ;;  %v4602_v9 = vmax.f32 %v3610_v54, 0.0  ;;  %v4605_v41 = vmax.f32 %v4604_v55, 0.0  ;;  %v1841_v8 = vmax.f32 %v1521_v45, 0.0  ;;  %v1524_v54 = vadd.f32 %v2905_v16, %v3524_v36  ;;  %v4611_v45 = vld [vmem:[#allocation17_spill] sm:$0xff] }
 0x151   :  { %v1742_v43 = vmax.f32 %v1124_v35, 0.0  ;;  %v1116_v60 = vadd.f32 %v3524_v36, %v1115_v33  ;;  %v1516_v51 = vadd.f32 %v3524_v36, %v1515_v50  ;;  %v1886_v12 = vmax.f32 %v4603_v24, %v1739_v32  ;;  %v4606_v50 = vld [vmem:[#allocation8_spill] sm:$0xff]  ;;  %v4608_v32 = vld [vmem:[#allocation13_spill] sm:$0xff] }
 0x152   :  { %v1888_v39 = vmax.f32 %v4602_v9, %v1741_v27  ;;  %v1937_v53 = vmax.f32 %v4605_v41, %v1839_v4  ;;  %v2808_v5 = vpop.f32.mrf.mxu0  ;;  %v2908_v14 = vpop.f32.mrf.mxu1  ;;  %v4607_v42 = vmax.f32 %v4606_v50, 0.0  ;;  %v4609_v9 = vmax.f32 %v4608_v32, 0.0  ;;  %v4614_v32 = vld [vmem:[#allocation18_spill] sm:$0xff] }
 0x153   :  { %v1740_v35 = vmax.f32 %v1116_v60, 0.0  ;;  %v1840_v22 = vmax.f32 %v1516_v51, 0.0  ;;  %v1137_v33 = vadd.f32 %v2808_v5, %v3524_v36  ;;  %v1984_v3 = vmax.f32 %v1886_v12, %v1935_v20 }
 0x154   :  { %v1936_v46 = vmax.f32 %v4607_v42, %v1838_v37  ;;  %v1986_v57 = vmax.f32 %v1888_v39, %v1937_v53  ;;  %v1128_v27 = vpop.f32.mrf.mxu0  ;;  %v1528_v38 = vpop.f32.mrf.mxu1  ;;  %v1889_v24 = vmax.f32 %v4609_v9, %v1742_v43  ;;  %v4610_v4 = vmax.f32 %v3585_v34, 0.0 }
 0x155   :  { %v4612_v60 = vmax.f32 %v4611_v45, 0.0  ;;  %v1129_v5 = vadd.f32 %v3524_v36, %v1128_v27  ;;  %v1830_v41 = vmax.f32 %v4054_v44, 0.0  ;;  %v2493_v42 = vpack.c.bf16 %v1984_v3, %v1983_v1 }
 0x156   :  { %v1887_v55 = vmax.f32 %v4610_v4, %v1740_v35  ;;  %v1745_v37 = vmax.f32 %v1137_v33, 0.0  ;;  %v1529_v20 = vadd.f32 %v3524_v36, %v1528_v38  ;;  %v2809_v16 = vpop.f32.mrf.mxu0  ;;  %v2909_v39 = vpop.f32.mrf.mxu1  ;;  %v4613_v12 = vmax.f32 %v3614_v40, 0.0 }
 0x157   :  { %v1938_v51 = vmax.f32 %v4612_v60, %v1840_v22  ;;  %v1743_v34 = vmax.f32 %v1129_v5, 0.0  ;;  %2605 = vst [vmem:[%s4459_s3 + $0x8] sm:$0xff] %v2493_v42   ;;  %v1842_v22 = vmax.f32 %v1524_v54, 0.0  ;;  %v1537_v35 = vadd.f32 %v2908_v14, %v3524_v36 }
 0x158   :  { %v1939_v53 = vmax.f32 %v4613_v12, %v1841_v8  ;;  %v1985_v43 = vmax.f32 %v1887_v55, %v1936_v46  ;;  %v1843_v27 = vmax.f32 %v1529_v20, 0.0  ;;  %v1140_v1 = vadd.f32 %v2809_v16, %v3524_v36  ;;  %v1131_v33 = vpop.f32.mrf.mxu0  ;;  %v1531_v3 = vpop.f32.mrf.mxu1  ;;  %v4617_v55 = vld [vmem:[#allocation19_spill] sm:$0xff] }
 0x159   :  { %v1987_v50 = vmax.f32 %v1889_v24, %v1938_v51  ;;  %v4615_v9 = vmax.f32 %v4614_v32, 0.0  ;;  %v1132_v8 = vadd.f32 %v3524_v36, %v1131_v33  ;;  %v1532_v46 = vadd.f32 %v3524_v36, %v1531_v3 }
 0x15a   :  { %v2498_v38 = vpack.c.bf16 %v1986_v57, %v1985_v43  ;;  %v4616_v24 = vmax.f32 %v3659_v61, 0.0  ;;  %v4618_v54 = vmax.f32 %v4617_v55, 0.0  ;;  %v1746_v14 = vmax.f32 %v1140_v1, 0.0  ;;  %v2812_v51 = vpop.f32.mrf.mxu0  ;;  %v2912_v5 = vpop.f32.mrf.mxu1 }
 0x15b   :  { %v1890_v40 = vmax.f32 %v4615_v9, %v1743_v34  ;;  %v1540_v60 = vadd.f32 %v2909_v39, %v3524_v36  ;;  %v1744_v42 = vmax.f32 %v1132_v8, 0.0  ;;  %v1844_v20 = vmax.f32 %v1532_v46, 0.0  ;;  %v4619_v39 = vld [vmem:[#allocation16_spill] sm:$0xff] }
 0x15c   :  { %v1892_v4 = vmax.f32 %v4616_v24, %v1745_v37  ;;  %v1941_v45 = vmax.f32 %v4618_v54, %v1843_v27  ;;  %2606 = vst [vmem:[%s4459_s3 + $0x10] sm:$0xff] %v2498_v38   ;;  %v1153_v16 = vadd.f32 %v2812_v51, %v3524_v36  ;;  %v4102_v61 = vadd.f32 %v3524_v36, %v3842_v25  ;;  %v1144_v27 = vpop.f32.mrf.mxu0  ;;  %v1544_v1 = vpop.f32.mrf.mxu1 }
 0x15d   :  { %v1988_v57 = vmax.f32 %v1890_v40, %v1939_v53  ;;  %v4106_v37 = vadd.f32 %v3524_v36, %v3844_v19  ;;  %v4620_v12 = vmax.f32 %v4619_v39, 0.0  ;;  %v4621_v53 = vld [vmem:[#allocation20_spill] sm:$0xff]  ;;  %v4623_v32 = vmax.f32 %v3636_v58, 0.0 }
 0x15e   :  { %v1990_v34 = vmax.f32 %v1892_v4, %v1941_v45  ;;  %v4622_v3 = vmax.f32 %v4621_v53, 0.0  ;;  %v4624_v25 = vmax.f32 %v3640_v59, 0.0  ;;  %v1845_v8 = vmax.f32 %v1537_v35, 0.0  ;;  %v2913_v4 = vpop.f32.mrf.mxu1 }
 0x15f   :  { %v1940_v43 = vmax.f32 %v4620_v12, %v1842_v22  ;;  %v2503_v33 = vpack.c.bf16 %v1988_v57, %v1987_v50  ;;  %v1891_v9 = vmax.f32 %v4623_v32, %v1744_v42  ;;  %v1749_v46 = vmax.f32 %v1153_v16, 0.0  ;;  %v2813_v22 = vpop.f32.mrf.mxu0 }
 0x160   :  { %v1893_v38 = vmax.f32 %v4622_v3, %v1746_v14  ;;  %v1942_v40 = vmax.f32 %v4624_v25, %v1844_v20  ;;  %v1145_v19 = vadd.f32 %v3524_v36, %v1144_v27  ;;  %v1545_v24 = vadd.f32 %v3524_v36, %v1544_v1  ;;  %v1547_v57 = vpop.f32.mrf.mxu1 }
 0x161   :  { %2607 = vst [vmem:[%s4459_s3 + $0x18] sm:$0xff] %v2503_v33   ;;  %v1846_v50 = vmax.f32 %v1540_v60, 0.0  ;;  %v1989_v55 = vmax.f32 %v1891_v9, %v1940_v43  ;;  %v1156_v58 = vadd.f32 %v2813_v22, %v3524_v36  ;;  %v1728_v59 = vmax.f32 %v4102_v61, 0.0  ;;  %v1147_v51 = vpop.f32.mrf.mxu0 }
 0x162   :  { %v1991_v54 = vmax.f32 %v1893_v38, %v1942_v40  ;;  %v1553_v35 = vadd.f32 %v2912_v5, %v3524_v36  ;;  %v1747_v45 = vmax.f32 %v1145_v19, 0.0  ;;  %v1847_v14 = vmax.f32 %v1545_v24, 0.0  ;;  %v4628_v5 = vld [vmem:[#allocation22_spill] sm:$0xff]  ;;  %v2916_v32 = vpop.f32.mrf.mxu1 }
 0x163   :  { %v2508_v42 = vpack.c.bf16 %v1990_v34, %v1989_v55  ;;  %v1750_v20 = vmax.f32 %v1156_v58, 0.0  ;;  %v1148_v16 = vadd.f32 %v3524_v36, %v1147_v51  ;;  %v1548_v39 = vadd.f32 %v3524_v36, %v1547_v57  ;;  %v2816_v38 = vpop.f32.mrf.mxu0  ;;  %v4630_v34 = vld [vmem:[#allocation21_spill] sm:$0xff]  ;;  %v4632_v55 = vld [vmem:[#allocation23_spill] sm:$0xff] }
 0x164   :  { %v4625_v60 = vmax.f32 %v3665_v63, 0.0  ;;  %v4626_v43 = vmax.f32 %v3706_v6, 0.0  ;;  %v4627_v1 = vmax.f32 %v3644_v47, 0.0  ;;  %v4629_v53 = vmax.f32 %v4628_v5, 0.0  ;;  %v1560_v22 = vpop.f32.mrf.mxu1  ;;  %v4635_v51 = vld [vmem:[#allocation25_spill] sm:$0xff] }
 0x165   :  { %v4631_v9 = vmax.f32 %v4630_v34, 0.0  ;;  %2608 = vst [vmem:[%s4459_s3 + $0x20] sm:$0xff] %v2508_v42   ;;  %v1748_v63 = vmax.f32 %v1148_v16, 0.0  ;;  %v1848_v40 = vmax.f32 %v1548_v39, 0.0  ;;  %v1169_v6 = vadd.f32 %v2816_v38, %v3524_v36  ;;  %v1160_v24 = vpop.f32.mrf.mxu0 }
 0x166   :  { %v1943_v12 = vmax.f32 %v4625_v60, %v1845_v8  ;;  %v1896_v27 = vmax.f32 %v4626_v43, %v1749_v46  ;;  %v1894_v33 = vmax.f32 %v4627_v1, %v1747_v45  ;;  %v1945_v3 = vmax.f32 %v4629_v53, %v1847_v14  ;;  %v2917_v43 = vpop.f32.mrf.mxu1 }
 0x167   :  { %v1944_v25 = vmax.f32 %v4631_v9, %v1846_v50  ;;  %v1849_v8 = vmax.f32 %v1553_v35, 0.0  ;;  %v1556_v19 = vadd.f32 %v2913_v4, %v3524_v36  ;;  %v4633_v58 = vmax.f32 %v4632_v55, 0.0  ;;  %v2817_v4 = vpop.f32.mrf.mxu0 }
 0x168   :  { %v1992_v46 = vmax.f32 %v1894_v33, %v1943_v12  ;;  %v1994_v47 = vmax.f32 %v1896_v27, %v1945_v3  ;;  %v4634_v50 = vmax.f32 %v3681_v62, 0.0  ;;  %v4636_v57 = vmax.f32 %v4635_v51, 0.0  ;;  %v1563_v34 = vpop.f32.mrf.mxu1 }
 0x169   :  { %v1897_v45 = vmax.f32 %v4633_v58, %v1750_v20  ;;  %v1161_v16 = vadd.f32 %v3524_v36, %v1160_v24  ;;  %v1828_v39 = vmax.f32 %v4106_v37, 0.0  ;;  %v1753_v60 = vmax.f32 %v1169_v6, 0.0  ;;  %v1163_v38 = vpop.f32.mrf.mxu0  ;;  %v4641_v24 = vld [vmem:[#allocation27_spill] sm:$0xff] }
 0x16a   :  { %v1895_v14 = vmax.f32 %v4634_v50, %v1748_v63  ;;  %v1946_v42 = vmax.f32 %v4636_v57, %v1848_v40  ;;  %v2513_v35 = vpack.c.bf16 %v1992_v46, %v1991_v54  ;;  %v1561_v12 = vadd.f32 %v3524_v36, %v1560_v22  ;;  %v4638_v63 = vld [vmem:[#allocation26_spill] sm:$0xff] }
 0x16b   :  { %v4152_v27 = vadd.f32 %v3863_v7, %v3524_v36  ;;  %v1751_v1 = vmax.f32 %v1161_v16, 0.0  ;;  %v4637_v33 = vmax.f32 %v3710_v48, 0.0  ;;  %v1850_v54 = vmax.f32 %v1556_v19, 0.0  ;;  %v2820_v58 = vpop.f32.mrf.mxu0 }
 0x16c   :  { %v1993_v20 = vmax.f32 %v1895_v14, %v1944_v25  ;;  %v1995_v62 = vmax.f32 %v1897_v45, %v1946_v42  ;;  %2609 = vst [vmem:[%s4459_s3 + $0x28] sm:$0xff] %v2513_v35   ;;  %v1851_v53 = vmax.f32 %v1561_v12, 0.0  ;;  %v1172_v3 = vadd.f32 %v2817_v4, %v3524_v36  ;;  %v2920_v45 = vpop.f32.mrf.mxu1 }
 0x16d   :  { %v1947_v5 = vmax.f32 %v4637_v33, %v1849_v8  ;;  %v4639_v7 = vmax.f32 %v4638_v63, 0.0  ;;  %v1164_v25 = vadd.f32 %v3524_v36, %v1163_v38  ;;  %v1564_v6 = vadd.f32 %v3524_v36, %v1563_v34  ;;  %v1176_v12 = vpop.f32.mrf.mxu0  ;;  %v4650_v34 = vld [vmem:[#allocation31_spill] sm:$0xff] }
 0x16e   :  { %v2518_v9 = vpack.c.bf16 %v1994_v47, %v1993_v20  ;;  %v4640_v48 = vmax.f32 %v3755_v13, 0.0  ;;  %v1569_v46 = vadd.f32 %v2916_v32, %v3524_v36  ;;  %v4642_v19 = vmax.f32 %v4641_v24, 0.0  ;;  %v4643_v13 = vld [vmem:[#allocation2_spill] sm:$0xff]  ;;  %v4644_v32 = vld [vmem:[#allocation24_spill] sm:$0xff]  ;;  %v1576_v4 = vpop.f32.mrf.mxu1 }
 0x16f   :  { %v1898_v40 = vmax.f32 %v4639_v7, %v1751_v1  ;;  %v1754_v55 = vmax.f32 %v1172_v3, 0.0  ;;  %v1752_v50 = vmax.f32 %v1164_v25, 0.0  ;;  %v1852_v14 = vmax.f32 %v1564_v6, 0.0  ;;  %v4646_v1 = vld [vmem:[#allocation28_spill] sm:$0xff]  ;;  %v2821_v6 = vpop.f32.mrf.mxu0 }
 0x170   :  { %v1900_v8 = vmax.f32 %v4640_v48, %v1753_v60  ;;  %v1949_v22 = vmax.f32 %v4642_v19, %v1851_v53  ;;  %2610 = vst [vmem:[%s4459_s3 + $0x30] sm:$0xff] %v2518_v9   ;;  %v1185_v51 = vadd.f32 %v2820_v58, %v3524_v36  ;;  %v4175_v57 = vadd.f32 %v4643_v13, %v3524_v36  ;;  %v4648_v53 = vld [vmem:[#allocation30_spill] sm:$0xff] }
 0x171   :  { %v1996_v47 = vmax.f32 %v1898_v40, %v1947_v5  ;;  %v4645_v42 = vmax.f32 %v4644_v32, 0.0  ;;  %v1572_v60 = vadd.f32 %v2917_v43, %v3524_v36  ;;  %v4647_v33 = vmax.f32 %v4646_v1, 0.0  ;;  %v2921_v43 = vpop.f32.mrf.mxu1  ;;  %v1179_v58 = vpop.f32.mrf.mxu0  ;;  %v4652_v32 = vld [vmem:[#allocation34_spill] sm:$0xff] }
 0x172   :  { %v1998_v35 = vmax.f32 %v1900_v8, %v1949_v22  ;;  %v4649_v3 = vmax.f32 %v4648_v53, 0.0  ;;  %v4651_v9 = vmax.f32 %v4650_v34, 0.0  ;;  %v1853_v7 = vmax.f32 %v1569_v46, 0.0 }
 0x173   :  { %v1948_v16 = vmax.f32 %v4645_v42, %v1850_v54  ;;  %v2523_v20 = vpack.c.bf16 %v1996_v47, %v1995_v62  ;;  %v1901_v5 = vmax.f32 %v4647_v33, %v1754_v55  ;;  %v1757_v40 = vmax.f32 %v1185_v51, 0.0  ;;  %v1579_v47 = vpop.f32.mrf.mxu1 }
 0x174   :  { %v1899_v38 = vmax.f32 %v4649_v3, %v1752_v50  ;;  %v1950_v63 = vmax.f32 %v4651_v9, %v1852_v14  ;;  %v1177_v25 = vadd.f32 %v3524_v36, %v1176_v12  ;;  %v1577_v54 = vadd.f32 %v3524_v36, %v1576_v4  ;;  %v4654_v12 = vld [vmem:[#allocation41_spill] sm:$0xff]  ;;  %v2824_v3 = vpop.f32.mrf.mxu0 }
 0x175   :  { %2611 = vst [vmem:[%s4459_s3 + $0x38] sm:$0xff] %v2523_v20   ;;  %v1585_v8 = vadd.f32 %v2920_v45, %v3524_v36  ;;  %v1188_v24 = vadd.f32 %v2821_v6, %v3524_v36  ;;  %v1733_v19 = vmax.f32 %v4152_v27, 0.0  ;;  %v1854_v46 = vmax.f32 %v1572_v60, 0.0  ;;  %v4656_v20 = vld [vmem:[#allocation32_spill] sm:$0xff]  ;;  %v4658_v60 = vld [vmem:[#allocation33_spill] sm:$0xff] }
 0x176   :  { %v1997_v62 = vmax.f32 %v1899_v38, %v1948_v16  ;;  %v1999_v48 = vmax.f32 %v1901_v5, %v1950_v63  ;;  %v1755_v22 = vmax.f32 %v1177_v25, 0.0  ;;  %v1855_v55 = vmax.f32 %v1577_v54, 0.0  ;;  %v2924_v38 = vpop.f32.mrf.mxu1 }
 0x177   :  { %v1758_v14 = vmax.f32 %v1188_v24, 0.0  ;;  %v1180_v51 = vadd.f32 %v3524_v36, %v1179_v58  ;;  %v1580_v13 = vadd.f32 %v3524_v36, %v1579_v47  ;;  %v4653_v42 = vmax.f32 %v4652_v32, 0.0  ;;  %v1192_v24 = vpop.f32.mrf.mxu0  ;;  %v4664_v32 = vld [vmem:[#allocation37_spill] sm:$0xff] }
 0x178   :  { %v2528_v50 = vpack.c.bf16 %v1998_v35, %v1997_v62  ;;  %v4655_v45 = vmax.f32 %v4654_v12, 0.0  ;;  %v4657_v1 = vmax.f32 %v4656_v20, 0.0  ;;  %v4659_v5 = vmax.f32 %v4658_v60, 0.0 }
 0x179   :  { %v1951_v16 = vmax.f32 %v4653_v42, %v1853_v7  ;;  %v1857_v35 = vmax.f32 %v1585_v8, 0.0  ;;  %v1756_v34 = vmax.f32 %v1180_v51, 0.0  ;;  %v1856_v9 = vmax.f32 %v1580_v13, 0.0  ;;  %v4660_v7 = vld [vmem:[#allocation29_spill] sm:$0xff]  ;;  %v4666_v8 = vld [vmem:[#allocation38_spill] sm:$0xff] }
 0x17a   :  { %v1904_v4 = vmax.f32 %v4655_v45, %v1757_v40  ;;  %v1902_v33 = vmax.f32 %v4657_v1, %v1755_v22  ;;  %v1953_v53 = vmax.f32 %v4659_v5, %v1855_v55  ;;  %2612 = vst [vmem:[%s4459_s3 + $0x40] sm:$0xff] %v2528_v50   ;;  %v1201_v63 = vadd.f32 %v2824_v3, %v3524_v36  ;;  %v1592_v22 = vpop.f32.mrf.mxu1  ;;  %v4662_v55 = vld [vmem:[#allocation35_spill] sm:$0xff]  ;;  %v4668_v1 = vld [vmem:[#allocation42_spill] sm:$0xff] }
 0x17b   :  { %v4661_v25 = vmax.f32 %v4660_v7, 0.0  ;;  %v1588_v62 = vadd.f32 %v2921_v43, %v3524_v36  ;;  %v4663_v58 = vmax.f32 %v4662_v55, 0.0  ;;  %v4665_v42 = vmax.f32 %v4664_v32, 0.0 }
 0x17c   :  { %v2000_v54 = vmax.f32 %v1902_v33, %v1951_v16  ;;  %v2002_v6 = vmax.f32 %v1904_v4, %v1953_v53  ;;  %v4667_v51 = vmax.f32 %v4666_v8, 0.0  ;;  %v1193_v12 = vadd.f32 %v3524_v36, %v1192_v24  ;;  %v2825_v4 = vpop.f32.mrf.mxu0  ;;  %v2925_v20 = vpop.f32.mrf.mxu1 }
 0x17d   :  { %v1952_v40 = vmax.f32 %v4661_v25, %v1854_v46  ;;  %v1905_v47 = vmax.f32 %v4663_v58, %v1758_v14  ;;  %v1903_v50 = vmax.f32 %v4665_v42, %v1756_v34  ;;  %v4220_v46 = vadd.f32 %v3524_v36, %v3887_v15  ;;  %v4670_v25 = vld [vmem:[#allocation39_spill] sm:$0xff]  ;;  %v4673_v58 = vld [vmem:[#allocation40_spill] sm:$0xff] }
 0x17e   :  { %v1954_v13 = vmax.f32 %v4667_v51, %v1856_v9  ;;  %v2533_v16 = vpack.c.bf16 %v2000_v54, %v1999_v48  ;;  %v1761_v45 = vmax.f32 %v1201_v63, 0.0  ;;  %v1593_v43 = vadd.f32 %v3524_v36, %v1592_v22  ;;  %v1195_v9 = vpop.f32.mrf.mxu0  ;;  %v1595_v63 = vpop.f32.mrf.mxu1 }
 0x17f   :  { %v4669_v14 = vmax.f32 %v4668_v1, 0.0  ;;  %v2001_v60 = vmax.f32 %v1903_v50, %v1952_v40  ;;  %v1759_v53 = vmax.f32 %v1193_v12, 0.0  ;;  %v1858_v3 = vmax.f32 %v1588_v62, 0.0 }
 0x180   :  { %v2003_v5 = vmax.f32 %v1905_v47, %v1954_v13  ;;  %2613 = vst [vmem:[%s4459_s3 + $0x48] sm:$0xff] %v2533_v16   ;;  %v1601_v15 = vadd.f32 %v2924_v38, %v3524_v36  ;;  %v1859_v34 = vmax.f32 %v1593_v43, 0.0  ;;  %v1204_v48 = vadd.f32 %v2825_v4, %v3524_v36  ;;  %v2828_v42 = vpop.f32.mrf.mxu0  ;;  %v2928_v50 = vpop.f32.mrf.mxu1  ;;  %v4675_v16 = vld [vmem:[#allocation36_spill] sm:$0xff] }
 0x181   :  { %v1955_v33 = vmax.f32 %v4669_v14, %v1857_v35  ;;  %v2538_v7 = vpack.c.bf16 %v2002_v6, %v2001_v60  ;;  %v4671_v54 = vmax.f32 %v4670_v25, 0.0  ;;  %v1196_v35 = vadd.f32 %v3524_v36, %v1195_v9  ;;  %v4677_v60 = vld [vmem:[#allocation43_spill] sm:$0xff]  ;;  %v4680_v9 = vld [vmem:[#allocation45_spill] sm:$0xff] }
 0x182   :  { %v1596_v40 = vadd.f32 %v3524_v36, %v1595_v63  ;;  %v4672_v22 = vmax.f32 %v3851_v29, 0.0  ;;  %v4674_v62 = vmax.f32 %v4673_v58, 0.0  ;;  %v1762_v38 = vmax.f32 %v1204_v48, 0.0  ;;  %v1608_v1 = vpop.f32.mrf.mxu1 }
 0x183   :  { %v1906_v24 = vmax.f32 %v4671_v54, %v1759_v53  ;;  %v1604_v32 = vadd.f32 %v2925_v20, %v3524_v36  ;;  %2614 = vst [vmem:[%s4459_s3 + $0x50] sm:$0xff] %v2538_v7   ;;  %v1760_v8 = vmax.f32 %v1196_v35, 0.0  ;;  %v1217_v13 = vadd.f32 %v2828_v42, %v3524_v36  ;;  %v1208_v20 = vpop.f32.mrf.mxu0 }
 0x184   :  { %v1908_v55 = vmax.f32 %v4672_v22, %v1761_v45  ;;  %v1957_v47 = vmax.f32 %v4674_v62, %v1859_v34  ;;  %v1860_v51 = vmax.f32 %v1596_v40, 0.0  ;;  %v1731_v29 = vmax.f32 %v4220_v46, 0.0  ;;  %v2929_v35 = vpop.f32.mrf.mxu1 }
 0x185   :  { %v2004_v6 = vmax.f32 %v1906_v24, %v1955_v33  ;;  %v4246_v12 = vadd.f32 %v3524_v36, %v3889_v21  ;;  %v4676_v45 = vmax.f32 %v4675_v16, 0.0  ;;  %v4678_v53 = vmax.f32 %v4677_v60, 0.0 }
 0x186   :  { %v2006_v4 = vmax.f32 %v1908_v55, %v1957_v47  ;;  %v4679_v34 = vmax.f32 %v3828_v26, 0.0  ;;  %v4681_v63 = vmax.f32 %v4680_v9, 0.0  ;;  %v1861_v25 = vmax.f32 %v1601_v15, 0.0 }
 0x187   :  { %v1956_v43 = vmax.f32 %v4676_v45, %v1858_v3  ;;  %v2543_v14 = vpack.c.bf16 %v2004_v6, %v2003_v5  ;;  %v1909_v33 = vmax.f32 %v4678_v53, %v1762_v38  ;;  %v1765_v54 = vmax.f32 %v1217_v13, 0.0  ;;  %v2829_v3 = vpop.f32.mrf.mxu0  ;;  %v1611_v38 = vpop.f32.mrf.mxu1 }
 0x188   :  { %v1907_v48 = vmax.f32 %v4679_v34, %v1760_v8  ;;  %v1958_v7 = vmax.f32 %v4681_v63, %v1860_v51  ;;  %v1209_v21 = vadd.f32 %v3524_v36, %v1208_v20  ;;  %v1609_v24 = vadd.f32 %v3524_v36, %v1608_v1 }
 0x189   :  { %2615 = vst [vmem:[%s4459_s3 + $0x58] sm:$0xff] %v2543_v14   ;;  %v1862_v5 = vmax.f32 %v1604_v32, 0.0  ;;  %v1220_v26 = vadd.f32 %v2829_v3, %v3524_v36  ;;  %v1831_v55 = vmax.f32 %v4246_v12, 0.0  ;;  %v1617_v15 = vadd.f32 %v2928_v50, %v3524_v36  ;;  %v1211_v47 = vpop.f32.mrf.mxu0  ;;  %v4686_v50 = vld [vmem:[#allocation47_spill] sm:$0xff] }
 0x18a   :  { %v2005_v40 = vmax.f32 %v1907_v48, %v1956_v43  ;;  %v2007_v22 = vmax.f32 %v1909_v33, %v1958_v7  ;;  %v1763_v58 = vmax.f32 %v1209_v21, 0.0  ;;  %v1863_v62 = vmax.f32 %v1609_v24, 0.0  ;;  %v4684_v43 = vld [vmem:[#allocation46_spill] sm:$0xff]  ;;  %v2932_v33 = vpop.f32.mrf.mxu1 }
 0x18b   :  { %v1766_v6 = vmax.f32 %v1220_v26, 0.0  ;;  %v1212_v8 = vadd.f32 %v3524_v36, %v1211_v47  ;;  %v1612_v51 = vadd.f32 %v3524_v36, %v1611_v38  ;;  %v4682_v32 = vmax.f32 %v3857_v17, 0.0  ;;  %v2832_v53 = vpop.f32.mrf.mxu0  ;;  %v4693_v38 = vld [vmem:[#allocation9_spill] sm:$0xff] }
 0x18c   :  { %v2548_v42 = vpack.c.bf16 %v2006_v4, %v2005_v40  ;;  %v4683_v16 = vmax.f32 %v3898_v28, 0.0  ;;  %v4685_v20 = vmax.f32 %v4684_v43, 0.0  ;;  %v4687_v14 = vmax.f32 %v4686_v50, 0.0  ;;  %v4688_v4 = vld [vmem:[#allocation44_spill] sm:$0xff]  ;;  %v4282_v28 = vld [vmem:[%s4458_s2] ss:$0 sm:$0xff]  ;;  %v1624_v24 = vpop.f32.mrf.mxu1 }
 0x18d   :  { %v1959_v13 = vmax.f32 %v4682_v32, %v1861_v25  ;;  %v4689_v34 = vmax.f32 %v4688_v4, 0.0  ;;  %v1764_v36 = vmax.f32 %v1212_v8, 0.0  ;;  %v1864_v17 = vmax.f32 %v1612_v51, 0.0  ;;  %v1224_v21 = vpop.f32.mrf.mxu0 }
 0x18e   :  { %v1912_v45 = vmax.f32 %v4683_v16, %v1765_v54  ;;  %v1910_v1 = vmax.f32 %v4685_v20, %v1763_v58  ;;  %v1961_v60 = vmax.f32 %v4687_v14, %v1863_v62  ;;  %2616 = vst [vmem:[%s4459_s3 + $0x60] sm:$0xff] %v2548_v42   ;;  %v1233_v9 = vadd.f32 %v4282_v28, %v2832_v53  ;;  %v2933_v32 = vpop.f32.mrf.mxu1  ;;  %v4695_v14 = vld [vmem:[#allocation4_spill] sm:$0xff] }
 0x18f   :  { %v1960_v48 = vmax.f32 %v4689_v34, %v1862_v5  ;;  %v1865_v63 = vmax.f32 %v1617_v15, 0.0  ;;  %v1620_v54 = vadd.f32 %v4282_v28, %v2929_v35  ;;  %v4690_v3 = vmax.f32 %v3861_v49, 0.0  ;;  %v2833_v51 = vpop.f32.mrf.mxu0 }
 0x190   :  { %v2008_v7 = vmax.f32 %v1910_v1, %v1959_v13  ;;  %v2010_v25 = vmax.f32 %v1912_v45, %v1961_v60  ;;  %v4691_v40 = vmax.f32 %v3873_v30, 0.0  ;;  %v4692_v58 = vmax.f32 %v3877_v31, 0.0  ;;  %v1627_v1 = vpop.f32.mrf.mxu1 }
 0x191   :  { %v1913_v5 = vmax.f32 %v4690_v3, %v1766_v6  ;;  %v1225_v47 = vadd.f32 %v4282_v28, %v1224_v21  ;;  %v4295_v15 = vadd.f32 %v4282_v28, %v4693_v38  ;;  %v1769_v8 = vmax.f32 %v1233_v9, 0.0  ;;  %v1227_v20 = vpop.f32.mrf.mxu0  ;;  %v4699_v3 = vld [vmem:[#allocation3_spill] sm:$0xff] }
 0x192   :  { %v1911_v26 = vmax.f32 %v4691_v40, %v1764_v36  ;;  %v1962_v62 = vmax.f32 %v4692_v58, %v1864_v17  ;;  %v2553_v42 = vpack.c.bf16 %v2008_v7, %v2007_v22  ;;  %v1625_v35 = vadd.f32 %v4282_v28, %v1624_v24  ;;  %v2936_v7 = vpop.f32.mrf.mxu1 }
 0x193   :  { %v4300_v49 = vadd.f32 %v4282_v28, %v3916_v23  ;;  %v1767_v31 = vmax.f32 %v1225_v47, 0.0  ;;  %v4694_v13 = vmax.f32 %v3902_v0, 0.0  ;;  %v1866_v22 = vmax.f32 %v1620_v54, 0.0  ;;  %v4701_v47 = vld [vmem:[#allocation5_spill] sm:$0xff] }
 0x194   :  { %v2009_v30 = vmax.f32 %v1911_v26, %v1960_v48  ;;  %v2011_v6 = vmax.f32 %v1913_v5, %v1962_v62  ;;  %2617 = vst [vmem:[%s4459_s3 + $0x68] sm:$0xff] %v2553_v42   ;;  %v1867_v45 = vmax.f32 %v1625_v35, 0.0  ;;  %v1236_v43 = vadd.f32 %v4282_v28, %v2833_v51  ;;  %v1640_v58 = vpop.f32.mrf.mxu1 }
 0x195   :  { %v1963_v16 = vmax.f32 %v4694_v13, %v1865_v63  ;;  %v4696_v23 = vmax.f32 %v4695_v14, 0.0  ;;  %v1228_v53 = vadd.f32 %v4282_v28, %v1227_v20  ;;  %v1628_v4 = vadd.f32 %v4282_v28, %v1627_v1  ;;  %v2836_v63 = vpop.f32.mrf.mxu0 }
 0x196   :  { %v2558_v50 = vpack.c.bf16 %v2010_v25, %v2009_v30  ;;  %v4697_v0 = vmax.f32 %v3947_v52, 0.0  ;;  %v1633_v48 = vadd.f32 %v4282_v28, %v2932_v33  ;;  %v4698_v36 = vmax.f32 %v3894_v10, 0.0 }
 0x197   :  { %v1914_v60 = vmax.f32 %v4696_v23, %v1767_v31  ;;  %v1770_v9 = vmax.f32 %v1236_v43, 0.0  ;;  %v1768_v54 = vmax.f32 %v1228_v53, 0.0  ;;  %v1868_v21 = vmax.f32 %v1628_v4, 0.0  ;;  %v1240_v26 = vpop.f32.mrf.mxu0 }
 0x198   :  { %v1916_v34 = vmax.f32 %v4697_v0, %v1769_v8  ;;  %v1965_v17 = vmax.f32 %v4698_v36, %v1867_v45  ;;  %2618 = vst [vmem:[%s4459_s3 + $0x70] sm:$0xff] %v2558_v50   ;;  %v1249_v24 = vadd.f32 %v4282_v28, %v2836_v63  ;;  %v1734_v52 = vmax.f32 %v4295_v15, 0.0  ;;  %v4707_v63 = vld [vmem:[#allocation10_spill] sm:$0xff] }
 0x199   :  { %v2012_v25 = vmax.f32 %v1914_v60, %v1963_v16  ;;  %v4700_v5 = vmax.f32 %v4699_v3, 0.0  ;;  %v1636_v10 = vadd.f32 %v4282_v28, %v2933_v32  ;;  %v4702_v38 = vmax.f32 %v4701_v47, 0.0  ;;  %v2837_v45 = vpop.f32.mrf.mxu0  ;;  %v2937_v32 = vpop.f32.mrf.mxu1 }
 0x19a   :  { %v2014_v40 = vmax.f32 %v1916_v34, %v1965_v17  ;;  %v4703_v8 = vmax.f32 %v3924_v2, 0.0  ;;  %v4704_v51 = vmax.f32 %v3928_v11, 0.0  ;;  %v1869_v31 = vmax.f32 %v1633_v48, 0.0 }
 0x19b   :  { %v1964_v33 = vmax.f32 %v4700_v5, %v1866_v22  ;;  %v2563_v62 = vpack.c.bf16 %v2012_v25, %v2011_v6  ;;  %v1917_v42 = vmax.f32 %v4702_v38, %v1770_v9  ;;  %v1773_v13 = vmax.f32 %v1249_v24, 0.0  ;;  %v1243_v23 = vpop.f32.mrf.mxu0  ;;  %v1643_v60 = vpop.f32.mrf.mxu1 }
 0x19c   :  { %v1915_v35 = vmax.f32 %v4703_v8, %v1768_v54  ;;  %v1966_v30 = vmax.f32 %v4704_v51, %v1868_v21  ;;  %v1241_v16 = vadd.f32 %v4282_v28, %v1240_v26  ;;  %v1641_v22 = vadd.f32 %v4282_v28, %v1640_v58  ;;  %v4709_v54 = vld [vmem:[#allocation12_spill] sm:$0xff]  ;;  %v4711_v26 = vld [vmem:[#allocation6_spill] sm:$0xff] }
 0x19d   :  { %2619 = vst [vmem:[%s4459_s3 + $0x78] sm:$0xff] %v2563_v62   ;;  %v1649_v2 = vadd.f32 %v4282_v28, %v2936_v7  ;;  %v1252_v20 = vadd.f32 %v4282_v28, %v2837_v45  ;;  %v1834_v11 = vmax.f32 %v4300_v49, 0.0  ;;  %v1870_v1 = vmax.f32 %v1636_v10, 0.0  ;;  %v2840_v3 = vpop.f32.mrf.mxu0  ;;  %v2940_v5 = vpop.f32.mrf.mxu1 }
 0x19e   :  { %v2013_v6 = vmax.f32 %v1915_v35, %v1964_v33  ;;  %v2015_v43 = vmax.f32 %v1917_v42, %v1966_v30  ;;  %v1771_v50 = vmax.f32 %v1241_v16, 0.0  ;;  %v1871_v14 = vmax.f32 %v1641_v22, 0.0  ;;  %v4713_v35 = vld [vmem:[#allocation48_spill] sm:$0xff]  ;;  %v4717_v22 = vld [vmem:[#allocation51_spill] sm:$0xff] }
 0x19f   :  { %v1774_v4 = vmax.f32 %v1252_v20, 0.0  ;;  %v1244_v0 = vadd.f32 %v4282_v28, %v1243_v23  ;;  %v1644_v34 = vadd.f32 %v4282_v28, %v1643_v60  ;;  %v4705_v48 = vmax.f32 %v3953_v56, 0.0  ;;  %v1256_v42 = vpop.f32.mrf.mxu0  ;;  %v1656_v8 = vpop.f32.mrf.mxu1  ;;  %v4719_v20 = vld [vmem:[#allocation14_spill] sm:$0xff] }
 0x1a0   :  { %v2568_v53 = vpack.c.bf16 %v2014_v40, %v2013_v6  ;;  %v4706_v17 = vmax.f32 %v3993_v18, 0.0  ;;  %v4708_v7 = vmax.f32 %v4707_v63, 0.0  ;;  %v4710_v21 = vmax.f32 %v4709_v54, 0.0 }
 0x1a1   :  { %v1967_v36 = vmax.f32 %v4705_v48, %v1869_v31  ;;  %v1873_v33 = vmax.f32 %v1649_v2, 0.0  ;;  %v1772_v40 = vmax.f32 %v1244_v0, 0.0  ;;  %v1872_v10 = vmax.f32 %v1644_v34, 0.0  ;;  %v4715_v31 = vld [vmem:[#allocation50_spill] sm:$0xff]  ;;  %v2841_v23 = vpop.f32.mrf.mxu0  ;;  %v2941_v60 = vpop.f32.mrf.mxu1 }
 0x1a2   :  { %v1920_v9 = vmax.f32 %v4706_v17, %v1773_v13  ;;  %v1918_v25 = vmax.f32 %v4708_v7, %v1771_v50  ;;  %v1969_v24 = vmax.f32 %v4710_v21, %v1871_v14  ;;  %2620 = vst [vmem:[%s4459_s3 + $0x80] sm:$0xff] %v2568_v53   ;;  %v1265_v56 = vadd.f32 %v4282_v28, %v2840_v3  ;;  %v4720_v53 = vld [vmem:[#allocation56_spill] sm:$0xff]  ;;  %v4722_v21 = vld [vmem:[#allocation54_spill] sm:$0xff] }
 0x1a3   :  { %v4712_v18 = vmax.f32 %v4711_v26, 0.0  ;;  %v1652_v38 = vadd.f32 %v4282_v28, %v2937_v32  ;;  %v4714_v51 = vmax.f32 %v4713_v35, 0.0  ;;  %v4716_v13 = vmax.f32 %v4715_v31, 0.0  ;;  %v1259_v7 = vpop.f32.mrf.mxu0 }
 0x1a4   :  { %v2016_v62 = vmax.f32 %v1918_v25, %v1967_v36  ;;  %v2018_v47 = vmax.f32 %v1920_v9, %v1969_v24  ;;  %v4718_v45 = vmax.f32 %v4717_v22, 0.0  ;;  %v1257_v2 = vadd.f32 %v4282_v28, %v1256_v42  ;;  %v1659_v25 = vpop.f32.mrf.mxu1 }
 0x1a5   :  { %v1968_v58 = vmax.f32 %v4712_v18, %v1870_v1  ;;  %v1921_v30 = vmax.f32 %v4714_v51, %v1774_v4  ;;  %v1919_v16 = vmax.f32 %v4716_v13, %v1772_v40  ;;  %v4365_v1 = vadd.f32 %v4282_v28, %v4719_v20  ;;  %v4726_v51 = vld [vmem:[#allocation15_spill] sm:$0xff] }
 0x1a6   :  { %v1970_v6 = vmax.f32 %v4718_v45, %v1872_v10  ;;  %v2573_v50 = vpack.c.bf16 %v2016_v62, %v2015_v43  ;;  %v1777_v14 = vmax.f32 %v1265_v56, 0.0  ;;  %v1657_v32 = vadd.f32 %v4282_v28, %v1656_v8  ;;  %v4724_v56 = vld [vmem:[#allocation55_spill] sm:$0xff]  ;;  %v2844_v62 = vpop.f32.mrf.mxu0 }
 0x1a7   :  { %v4721_v4 = vmax.f32 %v4720_v53, 0.0  ;;  %v2017_v34 = vmax.f32 %v1919_v16, %v1968_v58  ;;  %v1775_v36 = vmax.f32 %v1257_v2, 0.0  ;;  %v1874_v17 = vmax.f32 %v1652_v38, 0.0  ;;  %v2944_v38 = vpop.f32.mrf.mxu1  ;;  %v4729_v2 = vld [vmem:[#allocation58_spill] sm:$0xff] }
 0x1a8   :  { %v2019_v48 = vmax.f32 %v1921_v30, %v1970_v6  ;;  %2621 = vst [vmem:[%s4459_s3 + $0x88] sm:$0xff] %v2573_v50   ;;  %v1665_v9 = vadd.f32 %v4282_v28, %v2940_v5  ;;  %v1875_v63 = vmax.f32 %v1657_v32, 0.0  ;;  %v1268_v43 = vadd.f32 %v4282_v28, %v2841_v23  ;;  %v1272_v22 = vpop.f32.mrf.mxu0 }
 0x1a9   :  { %v1971_v0 = vmax.f32 %v4721_v4, %v1873_v33  ;;  %v2578_v54 = vpack.c.bf16 %v2018_v47, %v2017_v34  ;;  %v4723_v24 = vmax.f32 %v4722_v21, 0.0  ;;  %v1260_v33 = vadd.f32 %v4282_v28, %v1259_v7  ;;  %v1672_v45 = vpop.f32.mrf.mxu1 }
 0x1aa   :  { %v1660_v40 = vadd.f32 %v4282_v28, %v1659_v25  ;;  %v1924_v10 = vmax.f32 %v1728_v59, %v1777_v14  ;;  %v4725_v26 = vmax.f32 %v4724_v56, 0.0  ;;  %v1778_v5 = vmax.f32 %v1268_v43, 0.0  ;;  %v4727_v59 = vld [vmem:[#allocation49_spill] sm:$0xff]  ;;  %v4731_v14 = vld [vmem:[#allocation60_spill] sm:$0xff] }
 0x1ab   :  { %v1922_v3 = vmax.f32 %v4723_v24, %v1775_v36  ;;  %v1668_v58 = vadd.f32 %v4282_v28, %v2941_v60  ;;  %2622 = vst [vmem:[%s4459_s3 + $0x90] sm:$0xff] %v2578_v54   ;;  %v1776_v42 = vmax.f32 %v1260_v33, 0.0  ;;  %v1281_v35 = vadd.f32 %v4282_v28, %v2844_v62  ;;  %v4733_v60 = vld [vmem:[#allocation61_spill] sm:$0xff] }
 0x1ac   :  { %v1973_v18 = vmax.f32 %v4725_v26, %v1875_v63  ;;  %v1876_v8 = vmax.f32 %v1660_v40, 0.0  ;;  %v1484_v61 = vadd.f32 %v4282_v28, %v4726_v51  ;;  %v4728_v30 = vmax.f32 %v4727_v59, 0.0  ;;  %v2945_v63 = vpop.f32.mrf.mxu1 }
 0x1ad   :  { %v2020_v47 = vmax.f32 %v1922_v3, %v1971_v0  ;;  %v1877_v13 = vmax.f32 %v1665_v9, 0.0  ;;  %v4730_v20 = vmax.f32 %v4729_v2, 0.0  ;;  %v4732_v32 = vmax.f32 %v4731_v14, 0.0  ;;  %v2845_v9 = vpop.f32.mrf.mxu0  ;;  %v4740_v14 = vld [vmem:[#allocation53_spill] sm:$0xff] }
 0x1ae   :  { %v1972_v31 = vmax.f32 %v4728_v30, %v1874_v17  ;;  %v2022_v16 = vmax.f32 %v1924_v10, %v1973_v18  ;;  %v4734_v53 = vmax.f32 %v4733_v60, 0.0  ;;  %v1878_v0 = vmax.f32 %v1668_v58, 0.0  ;;  %v1675_v40 = vpop.f32.mrf.mxu1 }
 0x1af   :  { %v2583_v6 = vpack.c.bf16 %v2020_v47, %v2019_v48  ;;  %v1925_v50 = vmax.f32 %v4730_v20, %v1778_v5  ;;  %v1923_v23 = vmax.f32 %v4732_v32, %v1776_v42  ;;  %v1781_v34 = vmax.f32 %v1281_v35, 0.0  ;;  %v1275_v33 = vpop.f32.mrf.mxu0  ;;  %v4735_v5 = vld [vmem:[#allocation59_spill] sm:$0xff]  ;;  %v4737_v47 = vld [vmem:[#allocation62_spill] sm:$0xff]  ;;  %v4739_v20 = vld [vmem:[#allocation52_spill] sm:$0xff] }
 0x1b0   :  { %v1974_v4 = vmax.f32 %v4734_v53, %v1876_v8  ;;  %v1273_v36 = vadd.f32 %v4282_v28, %v1272_v22  ;;  %v1673_v17 = vadd.f32 %v4282_v28, %v1672_v45  ;;  %v1681_v7 = vadd.f32 %v4282_v28, %v2944_v38 }
 0x1b1   :  { %2623 = vst [vmem:[%s4459_s3 + $0x98] sm:$0xff] %v2583_v6   ;;  %v2021_v48 = vmax.f32 %v1923_v23, %v1972_v31  ;;  %v1284_v25 = vadd.f32 %v4282_v28, %v2845_v9  ;;  %v1732_v54 = vmax.f32 %v4365_v1, 0.0  ;;  %v1975_v21 = vmax.f32 %v1828_v39, %v1877_v13  ;;  %v2848_v39 = vpop.f32.mrf.mxu0 }
 0x1b2   :  { %v2023_v43 = vmax.f32 %v1925_v50, %v1974_v4  ;;  %v1779_v24 = vmax.f32 %v1273_v36, 0.0  ;;  %v1879_v3 = vmax.f32 %v1673_v17, 0.0  ;;  %v1276_v26 = vadd.f32 %v4282_v28, %v1275_v33 }
 0x1b3   :  { %v2588_v10 = vpack.c.bf16 %v2022_v16, %v2021_v48  ;;  %v1782_v56 = vmax.f32 %v1284_v25, 0.0  ;;  %v1676_v18 = vadd.f32 %v4282_v28, %v1675_v40  ;;  %v4736_v58 = vmax.f32 %v4735_v5, 0.0  ;;  %v1288_v22 = vpop.f32.mrf.mxu0 }
 0x1b4   :  { %v1928_v38 = vmax.f32 %v1732_v54, %v1781_v34  ;;  %v4738_v42 = vmax.f32 %v4737_v47, 0.0  ;;  %v1977_v37 = vmax.f32 %v1830_v41, %v1879_v3  ;;  %v1881_v8 = vmax.f32 %v1681_v7, 0.0 }
 0x1b5   :  { %v1976_v62 = vmax.f32 %v4736_v58, %v1878_v0  ;;  %2624 = vst [vmem:[%s4459_s3 + $0xa0] sm:$0xff] %v2588_v10   ;;  %v1780_v35 = vmax.f32 %v1276_v26, 0.0  ;;  %v1880_v51 = vmax.f32 %v1676_v18, 0.0  ;;  %v1297_v59 = vadd.f32 %v4282_v28, %v2848_v39  ;;  %v2849_v32 = vpop.f32.mrf.mxu0  ;;  %v4741_v0 = vld [vmem:[#allocation7_spill] sm:$0xff] }
 0x1b6   :  { %v1926_v1 = vmax.f32 %v4738_v42, %v1779_v24  ;;  %v2026_v31 = vmax.f32 %v1928_v38, %v1977_v37  ;;  %v1929_v13 = vmax.f32 %v1733_v19, %v1782_v56  ;;  %v1684_v16 = vadd.f32 %v4282_v28, %v2945_v63  ;;  %v4742_v24 = vld [vmem:[#allocation57_spill] sm:$0xff] }
 0x1b7   :  { %v1927_v44 = vmax.f32 %v1731_v29, %v1780_v35  ;;  %v1978_v41 = vmax.f32 %v1831_v55, %v1880_v51  ;;  %v1785_v45 = vmax.f32 %v1297_v59, 0.0  ;;  %v1289_v6 = vadd.f32 %v4282_v28, %v1288_v22  ;;  %v1291_v53 = vpop.f32.mrf.mxu0 }
 0x1b8   :  { %v2024_v30 = vmax.f32 %v1926_v1, %v1975_v21  ;;  %v1832_v2 = vmax.f32 %v1484_v61, 0.0  ;;  %v1097_v50 = vadd.f32 %v4282_v28, %v4739_v20  ;;  %v1497_v27 = vadd.f32 %v4282_v28, %v4740_v14 }
 0x1b9   :  { %v2025_v23 = vmax.f32 %v1927_v44, %v1976_v62  ;;  %v2027_v60 = vmax.f32 %v1929_v13, %v1978_v41  ;;  %v1932_v46 = vmax.f32 %v1785_v45, %v1834_v11  ;;  %v1783_v29 = vmax.f32 %v1289_v6, 0.0 }
 0x1ba   :  { %v2593_v19 = vpack.c.bf16 %v2024_v30, %v2023_v43  ;;  %v1979_v12 = vmax.f32 %v1832_v2, %v1881_v8  ;;  %v1882_v55 = vmax.f32 %v1684_v16, 0.0  ;;  %v1300_v61 = vadd.f32 %v4282_v28, %v2849_v32 }
 0x1bb   :  { %v2598_v4 = vpack.c.bf16 %v2026_v31, %v2025_v23  ;;  %v1981_v34 = vmax.f32 %v4741_v0, %v1932_v46  ;;  %v1930_v36 = vmax.f32 %v1734_v52, %v1783_v29  ;;  %v1292_v17 = vadd.f32 %v4282_v28, %v1291_v53 }
 0x1bc   :  { %2625 = vst [vmem:[%s4459_s3 + $0xa8] sm:$0xff] %v2593_v19   ;;  %v1835_v49 = vmax.f32 %v1497_v27, 0.0  ;;  %v1786_v11 = vmax.f32 %v1300_v61, 0.0  ;;  %v1833_v9 = vmax.f32 %v4175_v57, 0.0  ;;  %v1735_v63 = vmax.f32 %v1097_v50, 0.0 }
 0x1bd   :  { %2626 = vst [vmem:[%s4459_s3 + $0xb0] sm:$0xff] %v2598_v4   ;;  %v2028_v48 = vmax.f32 %v1930_v36, %v1979_v12  ;;  %v1784_v43 = vmax.f32 %v1292_v17, 0.0 }
 0x1be   :  { %v1933_v7 = vmax.f32 %v1786_v11, %v1835_v49  ;;  %v1980_v25 = vmax.f32 %v1833_v9, %v1882_v55 }
 0x1bf   :  { %v2603_v54 = vpack.c.bf16 %v2028_v48, %v2027_v60  ;;  %v1931_v21 = vmax.f32 %v1735_v63, %v1784_v43 }
 0x1c0   :  { %v1982_v15 = vmax.f32 %v4742_v24, %v1933_v7 }
 0x1c1   :  { %2627 = vst [vmem:[%s4459_s3 + $0xb8] sm:$0xff] %v2603_v54   ;;  %v2029_v28 = vmax.f32 %v1931_v21, %v1980_v25 }
 0x1c2   :  { %v2488_v52 = vpack.c.bf16 %v1982_v15, %v1981_v34 }
 0x1c3   :  { %v2484_v57 = vpack.c.bf16 %v2029_v28, %v2029_v28 }
 0x1c4   :  { %2489 = vst [vmem:[%s4459_s3] sm:$0xff] %v2488_v52  }
 0x1c5   :  { %2275 = vst [vmem:[%s4459_s3 + $0xc0] sm:$0xf] %v2484_v57 }

// kernel: net_forward.4
= control target key start
LH: loop header
LB: loop body
LE: loop exit
PB: predicated region body
PF: predicated region fallthrough
CT: control target
= control target key end

     0   :  { %s1035_s1 = inlined_call_operand.vmem [shape: bf16[256,128], index: 1, kind: input, shape index: {}]   ;;  %s1036_s0 = inlined_call_operand.vmem [shape: bf16[224,256], index: 0, kind: input, shape index: {}]   ;;  %s1037_s2 = inlined_call_operand.vmem [shape: f32[1,128], index: 2, kind: input, shape index: {}]   ;;  %s1038_s3 = inlined_call_operand.vmem [shape: bf16[56,128], index: 3, kind: output, shape index: {}]  }
   0x1   :  { %v744_v0 = vld [vmem:[%s1035_s1 + $0x78] sm:$0xff]   ;;  %v746_v2 = vld [vmem:[%s1035_s1 + $0x70] sm:$0xff]   ;;  %v748_v4 = vld [vmem:[%s1035_s1 + $0x68] sm:$0xff]  }
   0x2   :  { %v745_v1 = vld [vmem:[%s1035_s1 + $0x38] sm:$0xff]   ;;  %628 = vmatprep.subr.bf16.mxu0 %v744_v0  ;;  %728 = vmatprep.subr.bf16.mxu1 %v744_v0  ;;  %v747_v3 = vld [vmem:[%s1035_s1 + $0x30] sm:$0xff]   ;;  %v749_v5 = vld [vmem:[%s1035_s1 + $0x28] sm:$0xff]  }
   0x3   :  { %629 = vmatpush3.bf16.msra.mxu0 %v745_v1  ;;  %736 = vmatpush3.bf16.msra.mxu1 %v745_v1  ;;  %v750_v6 = vld [vmem:[%s1035_s1 + $0x60] sm:$0xff]   ;;  %v752_v8 = vld [vmem:[%s1035_s1 + $0x58] sm:$0xff]   ;;  %v754_v10 = vld [vmem:[%s1035_s1 + $0x50] sm:$0xff]  }
   0x4   :  { %630 = vmatprep.subr.bf16.mxu0 %v746_v2  ;;  %729 = vmatprep.subr.bf16.mxu1 %v746_v2  ;;  %v751_v7 = vld [vmem:[%s1035_s1 + $0x20] sm:$0xff]   ;;  %v753_v9 = vld [vmem:[%s1035_s1 + $0x18] sm:$0xff]   ;;  %v755_v13 = vld [vmem:[%s1035_s1 + $0x10] sm:$0xff]  }
   0x5   :  { %v762_v11 = vld [vmem:[%s1036_s0 + $0x4] ss:$8 sps:$4 sm:$0xff]   ;;  %v765_v12 = vld [vmem:[%s1036_s0 + $0x74] ss:$8 sps:$4 sm:$0xff]   ;;  %v760_v18 = vld [vmem:[%s1036_s0] ss:$8 sps:$4 sm:$0xff]  }
   0x6   :  { %v756_v14 = vld [vmem:[%s1035_s1 + $0x48] sm:$0xff]   ;;  %350 = vmatprep.mubr.bf16.mxu0 %v762_v11  ;;  %406 = vmatprep.mubr.bf16.mxu1 %v765_v12  ;;  %v758_v16 = vld [vmem:[%s1035_s1 + $0x40] sm:$0xff]   ;;  %v763_v19 = vld [vmem:[%s1036_s0 + $0x70] ss:$8 sps:$4 sm:$0xff]  }
   0x7   :  { %631 = vmatpush3.bf16.msra.mxu0 %v747_v3  ;;  %737 = vmatpush3.bf16.msra.mxu1 %v747_v3  ;;  %v757_v15 = vld [vmem:[%s1035_s1 + $0x8] sm:$0xff]   ;;  %v759_v17 = vld [vmem:[%s1035_s1] sm:$0xff]   ;;  %v766_v20 = vld [vmem:[%s1036_s0 + $0x14] ss:$8 sps:$4 sm:$0xff]  }
   0x8   :  { %632 = vmatprep.subr.bf16.mxu0 %v748_v4  ;;  %730 = vmatprep.subr.bf16.mxu1 %v748_v4  ;;  %v768_v21 = vld [vmem:[%s1036_s0 + $0x84] ss:$8 sps:$4 sm:$0xff]   ;;  %v770_v22 = vld [vmem:[%s1036_s0 + $0x10] ss:$8 sps:$4 sm:$0xff]   ;;  %v771_v23 = vld [vmem:[%s1036_s0 + $0x80] ss:$8 sps:$4 sm:$0xff]  }
   0x9   :  { %v772_v24 = vld [vmem:[%s1036_s0 + $0x24] ss:$8 sps:$4 sm:$0xff]   ;;  %v774_v25 = vld [vmem:[%s1036_s0 + $0x94] ss:$8 sps:$4 sm:$0xff]   ;;  %v776_v26 = vld [vmem:[%s1036_s0 + $0x20] ss:$8 sps:$4 sm:$0xff]  }
   0xa   :  { %v777_v27 = vld [vmem:[%s1036_s0 + $0x90] ss:$8 sps:$4 sm:$0xff]   ;;  %v778_v28 = vld [vmem:[%s1036_s0 + $0x34] ss:$8 sps:$4 sm:$0xff]   ;;  %v780_v29 = vld [vmem:[%s1036_s0 + $0xa4] ss:$8 sps:$4 sm:$0xff]  }
   0xb   :  { %633 = vmatpush3.bf16.msra.mxu0 %v749_v5  ;;  %738 = vmatpush3.bf16.msra.mxu1 %v749_v5  ;;  %v782_v30 = vld [vmem:[%s1036_s0 + $0x30] ss:$8 sps:$4 sm:$0xff]   ;;  %v783_v31 = vld [vmem:[%s1036_s0 + $0xa0] ss:$8 sps:$4 sm:$0xff]   ;;  %v784_v32 = vld [vmem:[%s1036_s0 + $0x44] ss:$8 sps:$4 sm:$0xff]  }
   0xc   :  { %634 = vmatprep.subr.bf16.mxu0 %v750_v6  ;;  %731 = vmatprep.subr.bf16.mxu1 %v750_v6  ;;  %v786_v33 = vld [vmem:[%s1036_s0 + $0xb4] ss:$8 sps:$4 sm:$0xff]   ;;  %v788_v34 = vld [vmem:[%s1036_s0 + $0x40] ss:$8 sps:$4 sm:$0xff]   ;;  %v789_v35 = vld [vmem:[%s1036_s0 + $0xb0] ss:$8 sps:$4 sm:$0xff]  }
   0xd   :  { %v790_v36 = vld [vmem:[%s1036_s0 + $0x54] ss:$8 sps:$4 sm:$0xff]   ;;  %v792_v37 = vld [vmem:[%s1036_s0 + $0xc4] ss:$8 sps:$4 sm:$0xff]   ;;  %v794_v38 = vld [vmem:[%s1036_s0 + $0x50] ss:$8 sps:$4 sm:$0xff]  }
   0xe   :  { %v795_v39 = vld [vmem:[%s1036_s0 + $0xc0] ss:$8 sps:$4 sm:$0xff]   ;;  %v796_v40 = vld [vmem:[%s1036_s0 + $0x64] ss:$8 sps:$4 sm:$0xff]   ;;  %v798_v41 = vld [vmem:[%s1036_s0 + $0xd4] ss:$8 sps:$4 sm:$0xff]  }
   0xf   :  { %635 = vmatpush3.bf16.msra.mxu0 %v751_v7  ;;  %739 = vmatpush3.bf16.msra.mxu1 %v751_v7  ;;  %v800_v42 = vld [vmem:[%s1036_s0 + $0x60] ss:$8 sps:$4 sm:$0xff]   ;;  %v801_v43 = vld [vmem:[%s1036_s0 + $0xd0] ss:$8 sps:$4 sm:$0xff]  }
  0x10   :  { %636 = vmatprep.subr.bf16.mxu0 %v752_v8  ;;  %732 = vmatprep.subr.bf16.mxu1 %v752_v8  ;;  %v981_v12 = vld [vmem:[%s1037_s2] ss:$0 sm:$0xff] }
  0x13   :  { %637 = vmatpush3.bf16.msra.mxu0 %v753_v9  ;;  %740 = vmatpush3.bf16.msra.mxu1 %v753_v9 }
  0x14   :  { %638 = vmatprep.subr.bf16.mxu0 %v754_v10  ;;  %733 = vmatprep.subr.bf16.mxu1 %v754_v10 }
  0x17   :  { %639 = vmatpush3.bf16.msra.mxu0 %v755_v13  ;;  %741 = vmatpush3.bf16.msra.mxu1 %v755_v13 }
  0x18   :  { %640 = vmatprep.subr.bf16.mxu0 %v756_v14  ;;  %734 = vmatprep.subr.bf16.mxu1 %v756_v14 }
  0x1b   :  { %641 = vmatpush3.bf16.msra.mxu0 %v757_v15  ;;  %742 = vmatpush3.bf16.msra.mxu1 %v757_v15 }
  0x1c   :  { %642 = vmatprep.subr.bf16.mxu0 %v758_v16  ;;  %735 = vmatprep.subr.bf16.mxu1 %v758_v16 }
  0x1f   :  { %643 = vmatpush3.bf16.msra.mxu0 %v759_v17  ;;  %743 = vmatpush3.bf16.msra.mxu1 %v759_v17 }
  0x22   :  { %351 = vmatmul.mubr.bf16.vlgmr.msra.gmra.mxu0 %v760_v18  ;;  %407 = vmatmul.mubr.bf16.vlgmr.msra.gmra.mxu1 %v763_v19 }
  0x23   :  { %358 = vmatprep.mubr.bf16.mxu0 %v766_v20  ;;  %414 = vmatprep.mubr.bf16.mxu1 %v768_v21 }
  0x2a   :  { %359 = vmatmul.mubr.bf16.gmra.mxu0 %v770_v22  ;;  %415 = vmatmul.mubr.bf16.gmra.mxu1 %v771_v23 }
  0x2b   :  { %366 = vmatprep.mubr.bf16.mxu0 %v772_v24  ;;  %422 = vmatprep.mubr.bf16.mxu1 %v774_v25 }
  0x32   :  { %367 = vmatmul.mubr.bf16.gmra.mxu0 %v776_v26  ;;  %423 = vmatmul.mubr.bf16.gmra.mxu1 %v777_v27 }
  0x33   :  { %374 = vmatprep.mubr.bf16.mxu0 %v778_v28  ;;  %430 = vmatprep.mubr.bf16.mxu1 %v780_v29 }
  0x3a   :  { %375 = vmatmul.mubr.bf16.gmra.mxu0 %v782_v30  ;;  %431 = vmatmul.mubr.bf16.gmra.mxu1 %v783_v31 }
  0x3b   :  { %382 = vmatprep.mubr.bf16.mxu0 %v784_v32  ;;  %438 = vmatprep.mubr.bf16.mxu1 %v786_v33 }
  0x42   :  { %383 = vmatmul.mubr.bf16.gmra.mxu0 %v788_v34  ;;  %439 = vmatmul.mubr.bf16.gmra.mxu1 %v789_v35 }
  0x43   :  { %390 = vmatprep.mubr.bf16.mxu0 %v790_v36  ;;  %446 = vmatprep.mubr.bf16.mxu1 %v792_v37 }
  0x4a   :  { %391 = vmatmul.mubr.bf16.gmra.mxu0 %v794_v38  ;;  %447 = vmatmul.mubr.bf16.gmra.mxu1 %v795_v39 }
  0x4b   :  { %398 = vmatprep.mubr.bf16.mxu0 %v796_v40  ;;  %454 = vmatprep.mubr.bf16.mxu1 %v798_v41 }
  0x52   :  { %399 = vmatmul.mubr.bf16.gmra.mxu0 %v800_v42  ;;  %455 = vmatmul.mubr.bf16.gmra.mxu1 %v801_v43 }
  0xe2   :  { %v644_v44 = vpop.f32.mrf.mxu0  ;;  %v686_v45 = vpop.f32.mrf.mxu1 }
  0xe4   :  { %v645_v46 = vpop.f32.mrf.mxu0  ;;  %v687_v47 = vpop.f32.mrf.mxu1 }
  0xe5   :  { %v646_v8 = vadd.f32 %v645_v46, %v644_v44  ;;  %v688_v9 = vadd.f32 %v687_v47, %v686_v45 }
  0xe6   :  { %v647_v48 = vpop.f32.mrf.mxu0  ;;  %v689_v49 = vpop.f32.mrf.mxu1 }
  0xe7   :  { %v353_v19 = vadd.f32 %v646_v8, %v981_v12  ;;  %v409_v20 = vadd.f32 %v688_v9, %v981_v12 }
  0xe8   :  { %v648_v50 = vpop.f32.mrf.mxu0  ;;  %v690_v51 = vpop.f32.mrf.mxu1 }
  0xe9   :  { %v649_v13 = vadd.f32 %v648_v50, %v647_v48  ;;  %v691_v14 = vadd.f32 %v690_v51, %v689_v49  ;;  %v463_v34 = vmax.f32 %v353_v19, 0.0  ;;  %v477_v35 = vmax.f32 %v409_v20, 0.0 }
  0xea   :  { %v650_v52 = vpop.f32.mrf.mxu0  ;;  %v692_v53 = vpop.f32.mrf.mxu1 }
  0xeb   :  { %v356_v25 = vadd.f32 %v649_v13, %v981_v12  ;;  %v412_v26 = vadd.f32 %v691_v14, %v981_v12 }
  0xec   :  { %v651_v54 = vpop.f32.mrf.mxu0  ;;  %v693_v55 = vpop.f32.mrf.mxu1 }
  0xed   :  { %v652_v27 = vadd.f32 %v651_v54, %v650_v52  ;;  %v694_v36 = vadd.f32 %v693_v55, %v692_v53  ;;  %v464_v43 = vmax.f32 %v356_v25, 0.0  ;;  %v478_v49 = vmax.f32 %v412_v26, 0.0 }
  0xee   :  { %v653_v56 = vpop.f32.mrf.mxu0  ;;  %v695_v57 = vpop.f32.mrf.mxu1 }
  0xef   :  { %v361_v44 = vadd.f32 %v652_v27, %v981_v12  ;;  %v417_v53 = vadd.f32 %v694_v36, %v981_v12 }
  0xf0   :  { %v654_v58 = vpop.f32.mrf.mxu0  ;;  %v696_v59 = vpop.f32.mrf.mxu1 }
  0xf1   :  { %v655_v37 = vadd.f32 %v654_v58, %v653_v56  ;;  %v697_v40 = vadd.f32 %v696_v59, %v695_v57  ;;  %v479_v20 = vmax.f32 %v417_v53, 0.0 }
  0xf2   :  { %v954_v60 = vpop.f32.mrf.mxu0  ;;  %v956_v61 = vpop.f32.mrf.mxu1 }
  0xf3   :  { %v364_v54 = vadd.f32 %v655_v37, %v981_v12  ;;  %v420_v58 = vadd.f32 %v697_v40, %v981_v12 }
  0xf4   :  { %v958_v62 = vpop.f32.mrf.mxu0  ;;  %v960_v63 = vpop.f32.mrf.mxu1 }
  0xf5   :  { %v480_v26 = vmax.f32 %v420_v58, 0.0 }
  0xf6   :  { %v962_v0 = vpop.f32.mrf.mxu0  ;;  %v964_v1 = vpop.f32.mrf.mxu1 }
  0xf8   :  { %v966_v2 = vpop.f32.mrf.mxu0  ;;  %v968_v3 = vpop.f32.mrf.mxu1 }
  0xfa   :  { %v970_v4 = vpop.f32.mrf.mxu0  ;;  %v972_v5 = vpop.f32.mrf.mxu1 }
  0xfc   :  { %v974_v6 = vpop.f32.mrf.mxu0  ;;  %v976_v7 = vpop.f32.mrf.mxu1 }
  0xfe   :  { %v665_v10 = vpop.f32.mrf.mxu0  ;;  %v707_v11 = vpop.f32.mrf.mxu1 }
 0x100   :  { %v666_v15 = vpop.f32.mrf.mxu0  ;;  %v708_v16 = vpop.f32.mrf.mxu1 }
 0x101   :  { %v667_v17 = vadd.f32 %v666_v15, %v665_v10  ;;  %v709_v18 = vadd.f32 %v708_v16, %v707_v11  ;;  %v465_v10 = vmax.f32 %v361_v44, 0.0  ;;  %v664_v44 = vadd.f32 %v974_v6, %v970_v4 }
 0x102   :  { %v668_v21 = vpop.f32.mrf.mxu0  ;;  %v710_v22 = vpop.f32.mrf.mxu1 }
 0x103   :  { %v380_v23 = vadd.f32 %v667_v17, %v981_v12  ;;  %v436_v24 = vadd.f32 %v709_v18, %v981_v12  ;;  %v377_v58 = vadd.f32 %v664_v44, %v981_v12 }
 0x104   :  { %v669_v28 = vpop.f32.mrf.mxu0  ;;  %v711_v29 = vpop.f32.mrf.mxu1 }
 0x105   :  { %v470_v30 = vmax.f32 %v380_v23, 0.0  ;;  %v484_v31 = vmax.f32 %v436_v24, 0.0  ;;  %v670_v32 = vadd.f32 %v669_v28, %v668_v21  ;;  %v712_v33 = vadd.f32 %v711_v29, %v710_v22 }
 0x106   :  { %v671_v38 = vpop.f32.mrf.mxu0  ;;  %v713_v39 = vpop.f32.mrf.mxu1  ;;  %v466_v21 = vmax.f32 %v364_v54, 0.0  ;;  %v658_v22 = vadd.f32 %v958_v62, %v954_v60 }
 0x107   :  { %v385_v41 = vadd.f32 %v670_v32, %v981_v12  ;;  %v441_v42 = vadd.f32 %v712_v33, %v981_v12  ;;  %v491_v45 = vmax.f32 %v463_v34, %v470_v30  ;;  %v498_v46 = vmax.f32 %v477_v35, %v484_v31 }
 0x108   :  { %v672_v47 = vpop.f32.mrf.mxu0  ;;  %v714_v48 = vpop.f32.mrf.mxu1  ;;  %v700_v30 = vadd.f32 %v960_v63, %v956_v61  ;;  %v661_v31 = vadd.f32 %v966_v2, %v962_v0  ;;  %v703_v61 = vadd.f32 %v968_v3, %v964_v1  ;;  %v706_v1 = vadd.f32 %v976_v7, %v972_v5 }
 0x109   :  { %v471_v50 = vmax.f32 %v385_v41, 0.0  ;;  %v485_v51 = vmax.f32 %v441_v42, 0.0  ;;  %v673_v52 = vadd.f32 %v672_v47, %v671_v38  ;;  %v715_v55 = vadd.f32 %v714_v48, %v713_v39 }
 0x10a   :  { %v674_v56 = vpop.f32.mrf.mxu0  ;;  %v716_v57 = vpop.f32.mrf.mxu1  ;;  %v505_v11 = vmax.f32 %v491_v45, %v498_v46  ;;  %v369_v38 = vadd.f32 %v658_v22, %v981_v12  ;;  %v425_v42 = vadd.f32 %v700_v30, %v981_v12 }
 0x10b   :  { %v492_v59 = vmax.f32 %v464_v43, %v471_v50  ;;  %v499_v8 = vmax.f32 %v478_v49, %v485_v51  ;;  %v388_v9 = vadd.f32 %v673_v52, %v981_v12  ;;  %v444_v13 = vadd.f32 %v715_v55, %v981_v12 }
 0x10c   :  { %v675_v14 = vpop.f32.mrf.mxu0  ;;  %v717_v15 = vpop.f32.mrf.mxu1  ;;  %v372_v43 = vadd.f32 %v661_v31, %v981_v12  ;;  %v428_v49 = vadd.f32 %v703_v61, %v981_v12  ;;  %v467_v55 = vmax.f32 %v369_v38, 0.0  ;;  %v481_v4 = vmax.f32 %v425_v42, 0.0 }
 0x10d   :  { %v506_v16 = vmax.f32 %v492_v59, %v499_v8  ;;  %v472_v17 = vmax.f32 %v388_v9, 0.0  ;;  %v676_v18 = vadd.f32 %v675_v14, %v674_v56  ;;  %v718_v19 = vadd.f32 %v717_v15, %v716_v57 }
 0x10e   :  { %v486_v23 = vmax.f32 %v444_v13, 0.0  ;;  %v677_v24 = vpop.f32.mrf.mxu0  ;;  %v719_v25 = vpop.f32.mrf.mxu1  ;;  %v468_v6 = vmax.f32 %v372_v43, 0.0  ;;  %v433_v8 = vadd.f32 %v706_v1, %v981_v12  ;;  %v482_v13 = vmax.f32 %v428_v49, 0.0 }
 0x10f   :  { %v614_v27 = vpack.c.bf16 %v506_v16, %v505_v11  ;;  %v393_v28 = vadd.f32 %v676_v18, %v981_v12  ;;  %v449_v29 = vadd.f32 %v718_v19, %v981_v12  ;;  %v493_v32 = vmax.f32 %v465_v10, %v472_v17 }
 0x110   :  { %v500_v33 = vmax.f32 %v479_v20, %v486_v23  ;;  %v678_v34 = vpop.f32.mrf.mxu0  ;;  %v720_v35 = vpop.f32.mrf.mxu1  ;;  %v483_v22 = vmax.f32 %v433_v8, 0.0 }
 0x111   :  { %615 = vst [vmem:[%s1038_s3] sm:$0xff] %v614_v27   ;;  %v473_v60 = vmax.f32 %v393_v28, 0.0  ;;  %v487_v62 = vmax.f32 %v449_v29, 0.0  ;;  %v679_v36 = vadd.f32 %v678_v34, %v677_v24  ;;  %v721_v37 = vadd.f32 %v720_v35, %v719_v25 }
 0x112   :  { %v680_v63 = vpop.f32.mrf.mxu0  ;;  %v722_v39 = vpop.f32.mrf.mxu1  ;;  %v507_v3 = vmax.f32 %v493_v32, %v500_v33 }
 0x113   :  { %v494_v0 = vmax.f32 %v466_v21, %v473_v60  ;;  %v501_v2 = vmax.f32 %v480_v26, %v487_v62  ;;  %v396_v40 = vadd.f32 %v679_v36, %v981_v12  ;;  %v452_v41 = vadd.f32 %v721_v37, %v981_v12 }
 0x114   :  { %v681_v45 = vpop.f32.mrf.mxu0  ;;  %v723_v46 = vpop.f32.mrf.mxu1  ;;  %v469_v21 = vmax.f32 %v377_v58, 0.0 }
 0x115   :  { %v508_v47 = vmax.f32 %v494_v0, %v501_v2  ;;  %v682_v48 = vadd.f32 %v681_v45, %v680_v63  ;;  %v474_v50 = vmax.f32 %v396_v40, 0.0  ;;  %v488_v51 = vmax.f32 %v452_v41, 0.0 }
 0x116   :  { %v724_v52 = vadd.f32 %v723_v46, %v722_v39  ;;  %v683_v53 = vpop.f32.mrf.mxu0  ;;  %v725_v54 = vpop.f32.mrf.mxu1 }
 0x117   :  { %v619_v56 = vpack.c.bf16 %v508_v47, %v507_v3  ;;  %v401_v57 = vadd.f32 %v682_v48, %v981_v12  ;;  %v495_v14 = vmax.f32 %v467_v55, %v474_v50  ;;  %v502_v15 = vmax.f32 %v481_v4, %v488_v51 }
 0x118   :  { %v457_v5 = vadd.f32 %v724_v52, %v981_v12  ;;  %v684_v7 = vpop.f32.mrf.mxu0  ;;  %v726_v59 = vpop.f32.mrf.mxu1 }
 0x119   :  { %626 = vst [vmem:[%s1038_s3 + $0x8] sm:$0xff] %v619_v56   ;;  %v475_v9 = vmax.f32 %v401_v57, 0.0  ;;  %v685_v10 = vadd.f32 %v684_v7, %v683_v53  ;;  %v727_v11 = vadd.f32 %v726_v59, %v725_v54  ;;  %v509_v25 = vmax.f32 %v495_v14, %v502_v15 }
 0x11a   :  { %v489_v16 = vmax.f32 %v457_v5, 0.0 }
 0x11b   :  { %v496_v17 = vmax.f32 %v468_v6, %v475_v9  ;;  %v404_v18 = vadd.f32 %v685_v10, %v981_v12  ;;  %v460_v19 = vadd.f32 %v727_v11, %v981_v12 }
 0x11c   :  { %v503_v20 = vmax.f32 %v482_v13, %v489_v16 }
 0x11d   :  { %v476_v23 = vmax.f32 %v404_v18, 0.0  ;;  %v490_v24 = vmax.f32 %v460_v19, 0.0 }
 0x11e   :  { %v510_v26 = vmax.f32 %v496_v17, %v503_v20 }
 0x11f   :  { %v497_v27 = vmax.f32 %v469_v21, %v476_v23  ;;  %v504_v28 = vmax.f32 %v483_v22, %v490_v24 }
 0x120   :  { %v624_v29 = vpack.c.bf16 %v510_v26, %v509_v25 }
 0x121   :  { %v511_v30 = vmax.f32 %v497_v27, %v504_v28 }
 0x122   :  { %627 = vst [vmem:[%s1038_s3 + $0x10] sm:$0xff] %v624_v29  }
 0x123   :  { %v610_v31 = vpack.c.bf16 %v511_v30, %v511_v30 }
 0x125   :  { %547 = vst [vmem:[%s1038_s3 + $0x18] sm:$0xf] %v610_v31 }

// kernel: net_forward.5
= control target key start
LH: loop header
LB: loop body
LE: loop exit
PB: predicated region body
PF: predicated region fallthrough
CT: control target
= control target key end

     0   :  { %v112_v30 = vlaneseq  ;;  %v870_v34 = vmov 1966171168   ;;  %v871_v37 = vmov 0.0   ;;  %s1091_s0 = inlined_call_operand.vmem [shape: bf16[2,512], index: 0, kind: input, shape index: {}]   ;;  %s1092_s1 = inlined_call_operand.vmem [shape: bf16[512,128], index: 1, kind: input, shape index: {}]   ;;  %s1093_s2 = inlined_call_operand.vmem [shape: f32[1,128], index: 2, kind: input, shape index: {}]   ;;  %s1094_s3 = inlined_call_operand.vmem [shape: bf16[128,128], index: 3, kind: input, shape index: {}]   ;;  %s1095_s4 = inlined_call_operand.vmem [shape: f32[1,128], index: 4, kind: input, shape index: {}]   ;;  %s1096_s5 = inlined_call_operand.vmem [shape: bf16[128,128], index: 5, kind: input, shape index: {}]   ;;  %s1097_s6 = inlined_call_operand.vmem [shape: f32[1,128], index: 6, kind: input, shape index: {}]   ;;  %s1098_s7 = inlined_call_operand.hbm [shape: f32[2,128], index: 7, kind: output, shape index: {}]  }
   0x1   :  { %v800_v0 = vld [vmem:[%s1092_s1 + $0x78] sm:$0xff]   ;;  %v804_v4 = vld [vmem:[%s1092_s1 + $0x70] sm:$0xff]   ;;  %v808_v8 = vld [vmem:[%s1092_s1 + $0x68] sm:$0xff]   ;;  %v110_v35 = vunpack.c.l.s4 %v870_v34 }
   0x2   :  { %v801_v1 = vld [vmem:[%s1092_s1 + $0xf8] sm:$0xff]   ;;  %694 = vmatprep.subr.bf16.mxu0 %v800_v0  ;;  %v805_v5 = vld [vmem:[%s1092_s1 + $0xf0] sm:$0xff]   ;;  %v809_v9 = vld [vmem:[%s1092_s1 + $0xe8] sm:$0xff]   ;;  %v113_v36 = vshrl.u32 %v112_v30, 7 }
   0x3   :  { %v802_v2 = vld [vmem:[%s1092_s1 + $0x38] sm:$0xff]   ;;  %716 = vmatprep.subr.bf16.mxu1 %v801_v1  ;;  %v806_v6 = vld [vmem:[%s1092_s1 + $0x30] sm:$0xff]   ;;  %v810_v10 = vld [vmem:[%s1092_s1 + $0x28] sm:$0xff]   ;;  %v111_v39 = vunpack.c.0.s8 %v110_v35 }
   0x4   :  { %v803_v3 = vld [vmem:[%s1092_s1 + $0xb8] sm:$0xff]   ;;  %695 = vmatpush3.bf16.msra.mxu0 %v802_v2  ;;  %v807_v7 = vld [vmem:[%s1092_s1 + $0xb0] sm:$0xff]   ;;  %v811_v11 = vld [vmem:[%s1092_s1 + $0xa8] sm:$0xff]  }
   0x5   :  { %717 = vmatpush3.bf16.msra.mxu1 %v803_v3  ;;  %696 = vmatprep.subr.bf16.mxu0 %v804_v4  ;;  %v812_v12 = vld [vmem:[%s1092_s1 + $0x60] sm:$0xff]   ;;  %v816_v16 = vld [vmem:[%s1092_s1 + $0x58] sm:$0xff]   ;;  %v820_v20 = vld [vmem:[%s1092_s1 + $0x50] sm:$0xff]   ;;  %v114_v40 = vsub.s32 %v111_v39, %v113_v36 }
   0x6   :  { %718 = vmatprep.subr.bf16.mxu1 %v805_v5  ;;  %v813_v13 = vld [vmem:[%s1092_s1 + $0xe0] sm:$0xff]   ;;  %v817_v17 = vld [vmem:[%s1092_s1 + $0xd8] sm:$0xff]   ;;  %v821_v21 = vld [vmem:[%s1092_s1 + $0xd0] sm:$0xff]  }
   0x7   :  { %v814_v14 = vld [vmem:[%s1092_s1 + $0x20] sm:$0xff]   ;;  %v818_v18 = vld [vmem:[%s1092_s1 + $0x18] sm:$0xff]   ;;  %v822_v22 = vld [vmem:[%s1092_s1 + $0x10] sm:$0xff]  }
   0x8   :  { %697 = vmatpush3.bf16.msra.mxu0 %v806_v6  ;;  %v815_v15 = vld [vmem:[%s1092_s1 + $0xa0] sm:$0xff]   ;;  %v819_v19 = vld [vmem:[%s1092_s1 + $0x98] sm:$0xff]   ;;  %v823_v23 = vld [vmem:[%s1092_s1 + $0x90] sm:$0xff]  }
   0x9   :  { %719 = vmatpush3.bf16.msra.mxu1 %v807_v7  ;;  %698 = vmatprep.subr.bf16.mxu0 %v808_v8  ;;  %v824_v24 = vld [vmem:[%s1092_s1 + $0x48] sm:$0xff]   ;;  %v828_v28 = vld [vmem:[%s1092_s1 + $0x40] sm:$0xff]   ;;  %v832_v41 = vld [vmem:[%s1094_s3 + $0x38] sm:$0xff]  }
   0xa   :  { %720 = vmatprep.subr.bf16.mxu1 %v809_v9  ;;  %v825_v25 = vld [vmem:[%s1092_s1 + $0xc8] sm:$0xff]   ;;  %v829_v29 = vld [vmem:[%s1092_s1 + $0xc0] sm:$0xff]   ;;  %v833_v46 = vld [vmem:[%s1094_s3 + $0x30] sm:$0xff]  }
   0xb   :  { %v826_v26 = vld [vmem:[%s1092_s1 + $0x8] sm:$0xff]   ;;  %v830_v31 = vld [vmem:[%s1092_s1] sm:$0xff]  }
   0xc   :  { %699 = vmatpush3.bf16.msra.mxu0 %v810_v10  ;;  %v827_v27 = vld [vmem:[%s1092_s1 + $0x88] sm:$0xff]   ;;  %v831_v32 = vld [vmem:[%s1092_s1 + $0x80] sm:$0xff]  }
   0xd   :  { %721 = vmatpush3.bf16.msra.mxu1 %v811_v11  ;;  %700 = vmatprep.subr.bf16.mxu0 %v812_v12  ;;  %v643_v33 = vld.sshfl [vmem:[%s1091_s0] sm:$0x33 pattern:$0x75316420] }
   0xe   :  { %722 = vmatprep.subr.bf16.mxu1 %v813_v13  ;;  %v108_v38 = vcombine.high %v643_v33, %v643_v33  ;;  %v115_v43 = vrot.slane %v643_v33, %v114_v40 }
  0x10   :  { %701 = vmatpush3.bf16.msra.mxu0 %v814_v14  ;;  %v122_v42 = vrot.slane %v108_v38, %v114_v40  ;;  %v123_v45 = vcombine.high %v115_v43, %v115_v43 }
  0x11   :  { %723 = vmatpush3.bf16.msra.mxu1 %v815_v15  ;;  %702 = vmatprep.subr.bf16.mxu0 %v816_v16 }
  0x12   :  { %724 = vmatprep.subr.bf16.mxu1 %v817_v17  ;;  %353 = vmatprep.mubr.bf16.mxu0 %v122_v42  ;;  %v124_v44 = vcombine.high %v122_v42, %v122_v42 }
  0x14   :  { %703 = vmatpush3.bf16.msra.mxu0 %v818_v18  ;;  %393 = vmatprep.mubr.bf16.mxu1 %v124_v44 }
  0x15   :  { %725 = vmatpush3.bf16.msra.mxu1 %v819_v19  ;;  %704 = vmatprep.subr.bf16.mxu0 %v820_v20 }
  0x16   :  { %726 = vmatprep.subr.bf16.mxu1 %v821_v21 }
  0x18   :  { %705 = vmatpush3.bf16.msra.mxu0 %v822_v22 }
  0x19   :  { %727 = vmatpush3.bf16.msra.mxu1 %v823_v23  ;;  %706 = vmatprep.subr.bf16.mxu0 %v824_v24 }
  0x1a   :  { %728 = vmatprep.subr.bf16.mxu1 %v825_v25 }
  0x1c   :  { %707 = vmatpush3.bf16.msra.mxu0 %v826_v26 }
  0x1d   :  { %729 = vmatpush3.bf16.msra.mxu1 %v827_v27  ;;  %708 = vmatprep.subr.bf16.mxu0 %v828_v28 }
  0x1e   :  { %730 = vmatprep.subr.bf16.mxu1 %v829_v29 }
  0x20   :  { %709 = vmatpush3.bf16.msra.mxu0 %v830_v31 }
  0x21   :  { %731 = vmatpush3.bf16.msra.mxu1 %v831_v32  ;;  %756 = vmatprep.subr.bf16.mxu0 %v871_v37 }
  0x22   :  { %776 = vmatprep.subr.bf16.mxu1 %v871_v37 }
  0x23   :  { %354 = vmatmul.mubr.bf16.vlgmr.msra.gmra.mxu0 %v115_v43 }
  0x24   :  { %757 = vmatpush3.bf16.msra.mxu0 %v832_v41  ;;  %394 = vmatmul.mubr.bf16.vlgmr.msra.gmra.mxu1 %v123_v45 }
  0x25   :  { %758 = vmatprep.subr.bf16.mxu0 %v871_v37 }
  0x26   :  { %12 = vsyncpa [#allocation3], 0  ;;  %v834_v47 = vld [vmem:[%s1094_s3 + $0x28] sm:$0xff]   ;;  %v835_v48 = vld [vmem:[%s1094_s3 + $0x20] sm:$0xff]   ;;  %vm872_vm0 = vmmov 0   ;;  %s873_s30 = smov [#allocation2]  }
  0x27   :  { %v836_v49 = vld [vmem:[%s1094_s3 + $0x18] sm:$0xff]   ;;  %v837_v50 = vld [vmem:[%s1094_s3 + $0x10] sm:$0xff]   ;;  %v838_v51 = vld [vmem:[%s1094_s3 + $0x8] sm:$0xff]   ;;  %772 = vmatprep.mubr.msk.bf16.mxu0 %vm872_vm0, %v871_v37  ;;  %792 = vmatprep.mubr.msk.bf16.mxu1 %vm872_vm0, %v871_v37  ;;  %s634_s8 = sshll.u32 %s873_s30, 4  ;;  %s635_s8 = int_to_ptr.vmem [resolvable:$true] %s634_s8 }
  0x28   :  { %759 = vmatpush3.bf16.msra.mxu0 %v833_v46  ;;  %v839_v52 = vld [vmem:[%s1094_s3] sm:$0xff]   ;;  %v840_v53 = vld [vmem:[%s1096_s5 + $0x38] sm:$0xff]   ;;  %v841_v54 = vld [vmem:[%s1096_s5 + $0x30] sm:$0xff]   ;;  %p853_p1 = scmp.lt.s32.totalorder %s635_s8, %s635_s8 }
  0x29   :  { %760 = vmatprep.subr.bf16.mxu0 %v871_v37  ;;  %777 = vmatpush3.bf16.msra.mxu1 %v840_v53  ;;  %v842_v55 = vld [vmem:[%s1096_s5 + $0x28] sm:$0xff]   ;;  %v843_v56 = vld [vmem:[%s1096_s5 + $0x20] sm:$0xff]   ;;  %v844_v57 = vld [vmem:[%s1096_s5 + $0x18] sm:$0xff]  }
  0x2a   :  { %778 = vmatprep.subr.bf16.mxu1 %v871_v37  ;;  %v845_v58 = vld [vmem:[%s1096_s5 + $0x10] sm:$0xff]   ;;  %v642_v61 = vld [vmem:[%s1093_s2] ss:$0 sm:$0xff]  ;;  %v846_v10 = vld [vmem:[%s1096_s5 + $0x8] sm:$0xff]  }
  0x2b   :  { %v847_v11 = vld [vmem:[%s1096_s5] sm:$0xff]  }
  0x2c   :  { %761 = vmatpush3.bf16.msra.mxu0 %v834_v47  ;;  %v676_v12 = vld [vmem:[%s1095_s4] ss:$0 sm:$0xff]  ;;  %s848_s4 = scalar_lea.vmem %s635_s8, 32 }
  0x2d   :  { %762 = vmatprep.subr.bf16.mxu0 %v871_v37  ;;  %779 = vmatpush3.bf16.msra.mxu1 %v841_v54  ;;  %v685_v20 = vld [vmem:[%s1097_s6] ss:$0 sm:$0xff]  ;;  %p849_p0 = scmp.ne.s32.totalorder %s635_s8, %s848_s4  ;;  %p854_p2 = scmp.lt.s32.totalorder %s848_s4, %s848_s4 }
  0x2e   :  { %780 = vmatprep.subr.bf16.mxu1 %v871_v37 }
  0x2f   :  { %p855_p3 = por %p854_p2, %p853_p1 }
  0x30   :  { %763 = vmatpush3.bf16.msra.mxu0 %v835_v48 }
  0x31   :  { %764 = vmatprep.subr.bf16.mxu0 %v871_v37  ;;  %781 = vmatpush3.bf16.msra.mxu1 %v842_v55  ;;  %p856_p4 = pnand %p855_p3, %p849_p0 }
  0x32   :  { %782 = vmatprep.subr.bf16.mxu1 %v871_v37 }
  0x34   :  { %765 = vmatpush3.bf16.msra.mxu0 %v836_v49 }
  0x35   :  { %766 = vmatprep.subr.bf16.mxu0 %v871_v37  ;;  %783 = vmatpush3.bf16.msra.mxu1 %v843_v56 }
  0x36   :  { %784 = vmatprep.subr.bf16.mxu1 %v871_v37 }
  0x38   :  { %767 = vmatpush3.bf16.msra.mxu0 %v837_v50 }
  0x39   :  { %768 = vmatprep.subr.bf16.mxu0 %v871_v37  ;;  %785 = vmatpush3.bf16.msra.mxu1 %v844_v57 }
  0x3a   :  { %786 = vmatprep.subr.bf16.mxu1 %v871_v37 }
  0x3c   :  { %769 = vmatpush3.bf16.msra.mxu0 %v838_v51 }
  0x3d   :  { %770 = vmatprep.subr.bf16.mxu0 %v871_v37  ;;  %787 = vmatpush3.bf16.msra.mxu1 %v845_v58 }
  0x3e   :  { %788 = vmatprep.subr.bf16.mxu1 %v871_v37 }
  0x40   :  { %771 = vmatpush3.bf16.msra.mxu0 %v839_v52 }
  0x41   :  { %789 = vmatpush3.bf16.msra.mxu1 %v846_v10 }
  0x42   :  { %790 = vmatprep.subr.bf16.mxu1 %v871_v37 }
  0x45   :  { %791 = vmatpush3.bf16.msra.mxu1 %v847_v11 }
  0xe3   :  { %v710_v59 = vpop.f32.mrf.mxu0 }
  0xe4   :  { %v732_v60 = vpop.f32.mrf.mxu1 }
  0xe5   :  { %v711_v62 = vpop.f32.mrf.mxu0 }
  0xe6   :  { %v712_v63 = vadd.f32 %v711_v62, %v710_v59  ;;  %v733_v0 = vpop.f32.mrf.mxu1 }
  0xe7   :  { %v713_v1 = vpop.f32.mrf.mxu0  ;;  %v734_v3 = vadd.f32 %v733_v0, %v732_v60 }
  0xe8   :  { %v356_v2 = vadd.f32 %v712_v63, %v642_v61  ;;  %v735_v4 = vpop.f32.mrf.mxu1 }
  0xe9   :  { %v714_v5 = vpop.f32.mrf.mxu0 }
  0xea   :  { %v396_v6 = vadd.f32 %v734_v3, %v356_v2  ;;  %v736_v7 = vpop.f32.mrf.mxu1 }
  0xec   :  { %v401_v8 = vmax.f32 %v396_v6, 0.0 }
  0xee   :  { %v402_v9 = vpack.c.bf16 %v401_v8, %v401_v8 }
  0xf0   :  { %773 = vmatmul.mubr.bf16.vlgmr.msra.gmra.mxu0 %v402_v9 }
 0x1b0   :  { %v508_v13 = vpop.f32.mrf.mxu0 }
 0x1b1   :  { %v509_v14 = vadd.f32 %v676_v12, %v508_v13 }
 0x1b2   :  { %v774_v15 = vpop.f32.mrf.mxu0 }
 0x1b3   :  { %v514_v16 = vmax.f32 %v509_v14, 0.0 }
 0x1b4   :  { %v511_v17 = vpop.f32.mrf.mxu0 }
 0x1b5   :  { %v515_v18 = vpack.c.bf16 %v514_v16, %v514_v16 }
 0x1b6   :  { %v775_v19 = vpop.f32.mrf.mxu0 }
 0x1b7   :  { %793 = vmatmul.mubr.bf16.vlgmr.msra.gmra.mxu1 %v515_v18 }
 0x277   :  { %v621_v21 = vpop.f32.mrf.mxu1 }
 0x278   :  { %v622_v22 = vadd.f32 %v685_v20, %v621_v21 }
 0x279   :  { %v794_v23 = vpop.f32.mrf.mxu1 }
 0x27a   :  { %627 = vst [vmem:[#allocation2] sm:$0x3] %v622_v22 }
 0x27b   :  { %v624_v24 = vpop.f32.mrf.mxu1 }
 0x27c   :  { %859 = shalt.err (!%p856_p4)
}
 0x27d   :  { %637 = dma.vmem_to_hbm [thread:$0]  %s635_s8, 32, %s1098_s7, [#allocation3]   ;;  %v795_v25 = vpop.f32.mrf.mxu1 }
 0x27e   :  { %868 = dma.done.wait [#allocation3], 32  }
 0x27f   :  { %869 = vsyncadd [#allocation3], 4294967264 }
 0x280   :  { %641 = vsyncpa [#allocation3], 1 }

</bundles_post_ra>
